<compile_context>
chip_gen: v7x
topology: tpu7x:2x2x1
jax: 0.10.0
libtpu: 0.0.40
codegen_flags: <defaults>
</compile_context>

<pallas_src>
import jax
import jax.numpy as jnp
from jax.experimental import pallas as pl
from jax.experimental.pallas import tpu as pltpu

NEG_SLOPE = 0.01  # PyTorch F.leaky_relu default negative_slope
LANE = 128        # TPU vreg lane width
TILE_M = 128      # batch tile (multiple of 128 -> fine on 4x128 and 2x256 MXUs)


def _leaky_relu(x):
    # One VPU max instead of compare+select (identical for 0 < slope < 1).
    return jnp.maximum(x, NEG_SLOPE * x)


def _round_up(n, m):
    return ((n + m - 1) // m) * m


def bignet_kernel(*refs):
    """refs = (x_ref, w1, b1, w2, b2, ..., w8, b8, out_ref).

    x/weights are bf16 (MXU operands), biases are f32, accumulation is f32.
    Feature dims are zero-padded to multiples of 128, so the math is identical
    to the unpadded network.
    """
    x_ref = refs[0]
    out_ref = refs[-1]
    params = refs[1:-1]
    n_layers = len(params) // 2

    h = x_ref[...]  # bf16 (TILE_M, in_p)
    for i in range(n_layers):
        w = params[2 * i][...]       # bf16 (in_p, out_p)
        b = params[2 * i + 1][...]   # f32  (1, out_p)  -> broadcasts
        acc = jnp.dot(h, w, preferred_element_type=jnp.float32) + b  # f32
        if i < n_layers - 1:
            acc = _leaky_relu(acc)              # f32 vector math (v5e-safe)
            # dropout_i: identity (eval mode)
            h = acc.astype(jnp.bfloat16)        # next MXU operand
        else:
            out_ref[...] = acc.astype(out_ref.dtype)


def bignet_forward(x, params, *, tile_m=TILE_M, interpret=False):
    """x: (batch, input_size) f32; params: list of (w: (in, out) f32, b: (1, out) f32)."""
    batch, in_dim = x.shape
    out_dim = params[-1][0].shape[1]

    # ---- pad feature dims to 128 (lane-dense) and batch to a multiple of tile_m ----
    in_p = _round_up(in_dim, LANE)
    batch_p = _round_up(max(batch, 1), tile_m)

    x_p = jnp.zeros((batch_p, in_p), jnp.bfloat16)
    x_p = x_p.at[:batch, :in_dim].set(x.astype(jnp.bfloat16))

    flat = []
    padded_dims = []
    prev_p = in_p
    for w, b in params:
        fi, fo = w.shape
        fo_p = _round_up(fo, LANE)
        w_p = jnp.zeros((prev_p, fo_p), jnp.bfloat16)
        w_p = w_p.at[:fi, :fo].set(w.astype(jnp.bfloat16))
        b_p = jnp.zeros((1, fo_p), jnp.float32)
        b_p = b_p.at[:, :fo].set(b.reshape(1, -1).astype(jnp.float32))
        flat.extend([w_p, b_p])
        padded_dims.append((prev_p, fo_p))
        prev_p = fo_p
    out_p = prev_p

    grid = (batch_p // tile_m,)

    in_specs = [pl.BlockSpec((tile_m, in_p), lambda i: (i, 0))]
    for (fi_p, fo_p) in padded_dims:
        # Weights / biases stay VMEM-resident: block index is constant across the grid.
        in_specs.append(pl.BlockSpec((fi_p, fo_p), lambda i: (0, 0)))
        in_specs.append(pl.BlockSpec((1, fo_p), lambda i: (0, 0)))
    out_specs = pl.BlockSpec((tile_m, out_p), lambda i: (i, 0))

    flops = 2 * batch_p * sum(fi_p * fo_p for fi_p, fo_p in padded_dims)
    bytes_accessed = (
        x_p.size * x_p.dtype.itemsize
        + sum(a.size * a.dtype.itemsize for a in flat)
        + batch_p * out_p * 4
    )

    out_padded = pl.pallas_call(
        bignet_kernel,
        out_shape=jax.ShapeDtypeStruct((batch_p, out_p), jnp.float32),
        grid=grid,
        in_specs=in_specs,
        out_specs=out_specs,
        compiler_params=pltpu.CompilerParams(
            dimension_semantics=("parallel",),
            vmem_limit_bytes=32 * 1024 * 1024,  # fits v7x's 64 MiB VMEM w/ headroom
        ),
        cost_estimate=pl.CostEstimate(
            flops=flops, transcendentals=0, bytes_accessed=bytes_accessed),
        interpret=interpret,
    )(x_p, *flat)

    return out_padded[:batch, :out_dim]


def init_bignet_params(key, input_size, hidden_size, output_size):
    """Deterministic init mimicking torch.nn.Linear default:
    W, b ~ U(-1/sqrt(fan_in), 1/sqrt(fan_in)). Stored as (in, out) so the
    kernel computes h @ W + b (== PyTorch's x @ W.T + b)."""
    dims = [input_size] + [hidden_size] * 7 + [output_size]
    params = []
    for i in range(8):
        fan_in, fan_out = dims[i], dims[i + 1]
        key, kw, kb = jax.random.split(key, 3)
        bound = 1.0 / jnp.sqrt(jnp.float32(fan_in))
        w = jax.random.uniform(kw, (fan_in, fan_out), jnp.float32, -bound, bound)
        b = jax.random.uniform(kb, (1, fan_out), jnp.float32, -bound, bound)
        params.append((w, b))
    return params


def bignet_reference(x, params, *, operand_dtype=jnp.float32):
    """Pure-JAX reference. With operand_dtype=bf16 it follows the same numeric
    path as the kernel (bf16 MXU operands, f32 accumulation)."""
    h = x.astype(jnp.float32)
    for i, (w, b) in enumerate(params):
        h = jnp.dot(h.astype(operand_dtype), w.astype(operand_dtype),
                    preferred_element_type=jnp.float32) + b.astype(jnp.float32)
        if i < len(params) - 1:
            h = _leaky_relu(h)
    return h


if __name__ == "__main__":
    input_size, hidden_size, output_size = 16, 32, 8
    batch = 8

    key = jax.random.PRNGKey(0)
    key, kx = jax.random.split(key)
    x = jax.random.normal(kx, (batch, input_size), jnp.float32)
    params = init_bignet_params(key, input_size, hidden_size, output_size)

    out = bignet_forward(x, params)
    out = jax.block_until_ready(out)
    assert out.shape == (batch, output_size)

    # Tight check vs a reference that uses the same bf16-operand / f32-accumulate path.
    ref_bf16 = bignet_reference(x, params, operand_dtype=jnp.bfloat16)
    assert jnp.allclose(out, ref_bf16, atol=1e-3, rtol=1e-3), "mismatch vs matched-precision reference"

    # Sanity check vs the full-f32 reference (bf16-level tolerance over 8 layers).
    ref_f32 = bignet_reference(x, params, operand_dtype=jnp.float32)
    assert jnp.allclose(out, ref_f32, atol=5e-2, rtol=5e-2), "mismatch vs f32 reference"

    print("KERNEL_OK")
</pallas_src>

<mosaic_0001>
module attributes {stable_mosaic.version = 11 : i64} {
  func.func @bignet_kernel(%arg0: i32, %arg1: memref<128x128xbf16, #tpu.memory_space<vmem>>, %arg2: memref<128x128xbf16, #tpu.memory_space<vmem>>, %arg3: memref<1x128xf32, #tpu.memory_space<vmem>>, %arg4: memref<128x128xbf16, #tpu.memory_space<vmem>>, %arg5: memref<1x128xf32, #tpu.memory_space<vmem>>, %arg6: memref<128x128xbf16, #tpu.memory_space<vmem>>, %arg7: memref<1x128xf32, #tpu.memory_space<vmem>>, %arg8: memref<128x128xbf16, #tpu.memory_space<vmem>>, %arg9: memref<1x128xf32, #tpu.memory_space<vmem>>, %arg10: memref<128x128xbf16, #tpu.memory_space<vmem>>, %arg11: memref<1x128xf32, #tpu.memory_space<vmem>>, %arg12: memref<128x128xbf16, #tpu.memory_space<vmem>>, %arg13: memref<1x128xf32, #tpu.memory_space<vmem>>, %arg14: memref<128x128xbf16, #tpu.memory_space<vmem>>, %arg15: memref<1x128xf32, #tpu.memory_space<vmem>>, %arg16: memref<128x128xbf16, #tpu.memory_space<vmem>>, %arg17: memref<1x128xf32, #tpu.memory_space<vmem>>, %arg18: memref<128x128xf32, #tpu.memory_space<vmem>>) attributes {dimension_semantics = [#tpu.dimension_semantics<parallel>], iteration_bounds = array<i64: 1>, scalar_prefetch = 0 : i64, scratch_operands = 0 : i64, tpu.core_type = #tpu.core_type<tc>, window_params = [{transform_indices = @transform_0, window_bounds = array<i64: 128, 128>}, {pipeline_mode = #tpu.pipeline_mode<synchronous>, transform_indices = @transform_1, window_bounds = array<i64: 128, 128>}, {pipeline_mode = #tpu.pipeline_mode<synchronous>, transform_indices = @transform_2, window_bounds = array<i64: 1, 128>}, {pipeline_mode = #tpu.pipeline_mode<synchronous>, transform_indices = @transform_3, window_bounds = array<i64: 128, 128>}, {pipeline_mode = #tpu.pipeline_mode<synchronous>, transform_indices = @transform_4, window_bounds = array<i64: 1, 128>}, {pipeline_mode = #tpu.pipeline_mode<synchronous>, transform_indices = @transform_5, window_bounds = array<i64: 128, 128>}, {pipeline_mode = #tpu.pipeline_mode<synchronous>, transform_indices = @transform_6, window_bounds = array<i64: 1, 128>}, {pipeline_mode = #tpu.pipeline_mode<synchronous>, transform_indices = @transform_7, window_bounds = array<i64: 128, 128>}, {pipeline_mode = #tpu.pipeline_mode<synchronous>, transform_indices = @transform_8, window_bounds = array<i64: 1, 128>}, {pipeline_mode = #tpu.pipeline_mode<synchronous>, transform_indices = @transform_9, window_bounds = array<i64: 128, 128>}, {pipeline_mode = #tpu.pipeline_mode<synchronous>, transform_indices = @transform_10, window_bounds = array<i64: 1, 128>}, {pipeline_mode = #tpu.pipeline_mode<synchronous>, transform_indices = @transform_11, window_bounds = array<i64: 128, 128>}, {pipeline_mode = #tpu.pipeline_mode<synchronous>, transform_indices = @transform_12, window_bounds = array<i64: 1, 128>}, {pipeline_mode = #tpu.pipeline_mode<synchronous>, transform_indices = @transform_13, window_bounds = array<i64: 128, 128>}, {pipeline_mode = #tpu.pipeline_mode<synchronous>, transform_indices = @transform_14, window_bounds = array<i64: 1, 128>}, {pipeline_mode = #tpu.pipeline_mode<synchronous>, transform_indices = @transform_15, window_bounds = array<i64: 128, 128>}, {pipeline_mode = #tpu.pipeline_mode<synchronous>, transform_indices = @transform_16, window_bounds = array<i64: 1, 128>}, {transform_indices = @transform_17, window_bounds = array<i64: 128, 128>}]} {
    %c0 = arith.constant 0 : index
    %c0_0 = arith.constant 0 : index
    %0 = vector.load %arg1[%c0, %c0_0] : memref<128x128xbf16, #tpu.memory_space<vmem>>, vector<128x128xbf16>
    %c0_1 = arith.constant 0 : index
    %c0_2 = arith.constant 0 : index
    %1 = vector.load %arg2[%c0_1, %c0_2] : memref<128x128xbf16, #tpu.memory_space<vmem>>, vector<128x128xbf16>
    %c0_3 = arith.constant 0 : index
    %c0_4 = arith.constant 0 : index
    %2 = vector.load %arg3[%c0_3, %c0_4] : memref<1x128xf32, #tpu.memory_space<vmem>>, vector<1x128xf32>
    %cst = arith.constant dense<0.000000e+00> : vector<128x128xf32>
    %3 = tpu.matmul %0, %1, %cst {dimension_numbers = #tpu.dot_dimension_numbers<[1], [0], [0], [1], [0, 0, 1, 1], [], []>} : vector<128x128xbf16>, vector<128x128xbf16>, vector<128x128xf32> -> vector<128x128xf32>
    %4 = vector.broadcast %2 : vector<1x128xf32> to vector<128x128xf32>
    %5 = arith.addf %3, %4 : vector<128x128xf32>
    %cst_5 = arith.constant 0.00999999977 : f32
    %6 = vector.broadcast %cst_5 : f32 to vector<128x128xf32>
    %7 = arith.mulf %6, %5 : vector<128x128xf32>
    %8 = arith.maximumf %5, %7 : vector<128x128xf32>
    %9 = arith.truncf %8 : vector<128x128xf32> to vector<128x128xbf16>
    %c0_6 = arith.constant 0 : index
    %c0_7 = arith.constant 0 : index
    %10 = vector.load %arg4[%c0_6, %c0_7] : memref<128x128xbf16, #tpu.memory_space<vmem>>, vector<128x128xbf16>
    %c0_8 = arith.constant 0 : index
    %c0_9 = arith.constant 0 : index
    %11 = vector.load %arg5[%c0_8, %c0_9] : memref<1x128xf32, #tpu.memory_space<vmem>>, vector<1x128xf32>
    %cst_10 = arith.constant dense<0.000000e+00> : vector<128x128xf32>
    %12 = tpu.matmul %9, %10, %cst_10 {dimension_numbers = #tpu.dot_dimension_numbers<[1], [0], [0], [1], [0, 0, 1, 1], [], []>} : vector<128x128xbf16>, vector<128x128xbf16>, vector<128x128xf32> -> vector<128x128xf32>
    %13 = vector.broadcast %11 : vector<1x128xf32> to vector<128x128xf32>
    %14 = arith.addf %12, %13 : vector<128x128xf32>
    %cst_11 = arith.constant 0.00999999977 : f32
    %15 = vector.broadcast %cst_11 : f32 to vector<128x128xf32>
    %16 = arith.mulf %15, %14 : vector<128x128xf32>
    %17 = arith.maximumf %14, %16 : vector<128x128xf32>
    %18 = arith.truncf %17 : vector<128x128xf32> to vector<128x128xbf16>
    %c0_12 = arith.constant 0 : index
    %c0_13 = arith.constant 0 : index
    %19 = vector.load %arg6[%c0_12, %c0_13] : memref<128x128xbf16, #tpu.memory_space<vmem>>, vector<128x128xbf16>
    %c0_14 = arith.constant 0 : index
    %c0_15 = arith.constant 0 : index
    %20 = vector.load %arg7[%c0_14, %c0_15] : memref<1x128xf32, #tpu.memory_space<vmem>>, vector<1x128xf32>
    %cst_16 = arith.constant dense<0.000000e+00> : vector<128x128xf32>
    %21 = tpu.matmul %18, %19, %cst_16 {dimension_numbers = #tpu.dot_dimension_numbers<[1], [0], [0], [1], [0, 0, 1, 1], [], []>} : vector<128x128xbf16>, vector<128x128xbf16>, vector<128x128xf32> -> vector<128x128xf32>
    %22 = vector.broadcast %20 : vector<1x128xf32> to vector<128x128xf32>
    %23 = arith.addf %21, %22 : vector<128x128xf32>
    %cst_17 = arith.constant 0.00999999977 : f32
    %24 = vector.broadcast %cst_17 : f32 to vector<128x128xf32>
    %25 = arith.mulf %24, %23 : vector<128x128xf32>
    %26 = arith.maximumf %23, %25 : vector<128x128xf32>
    %27 = arith.truncf %26 : vector<128x128xf32> to vector<128x128xbf16>
    %c0_18 = arith.constant 0 : index
    %c0_19 = arith.constant 0 : index
    %28 = vector.load %arg8[%c0_18, %c0_19] : memref<128x128xbf16, #tpu.memory_space<vmem>>, vector<128x128xbf16>
    %c0_20 = arith.constant 0 : index
    %c0_21 = arith.constant 0 : index
    %29 = vector.load %arg9[%c0_20, %c0_21] : memref<1x128xf32, #tpu.memory_space<vmem>>, vector<1x128xf32>
    %cst_22 = arith.constant dense<0.000000e+00> : vector<128x128xf32>
    %30 = tpu.matmul %27, %28, %cst_22 {dimension_numbers = #tpu.dot_dimension_numbers<[1], [0], [0], [1], [0, 0, 1, 1], [], []>} : vector<128x128xbf16>, vector<128x128xbf16>, vector<128x128xf32> -> vector<128x128xf32>
    %31 = vector.broadcast %29 : vector<1x128xf32> to vector<128x128xf32>
    %32 = arith.addf %30, %31 : vector<128x128xf32>
    %cst_23 = arith.constant 0.00999999977 : f32
    %33 = vector.broadcast %cst_23 : f32 to vector<128x128xf32>
    %34 = arith.mulf %33, %32 : vector<128x128xf32>
    %35 = arith.maximumf %32, %34 : vector<128x128xf32>
    %36 = arith.truncf %35 : vector<128x128xf32> to vector<128x128xbf16>
    %c0_24 = arith.constant 0 : index
    %c0_25 = arith.constant 0 : index
    %37 = vector.load %arg10[%c0_24, %c0_25] : memref<128x128xbf16, #tpu.memory_space<vmem>>, vector<128x128xbf16>
    %c0_26 = arith.constant 0 : index
    %c0_27 = arith.constant 0 : index
    %38 = vector.load %arg11[%c0_26, %c0_27] : memref<1x128xf32, #tpu.memory_space<vmem>>, vector<1x128xf32>
    %cst_28 = arith.constant dense<0.000000e+00> : vector<128x128xf32>
    %39 = tpu.matmul %36, %37, %cst_28 {dimension_numbers = #tpu.dot_dimension_numbers<[1], [0], [0], [1], [0, 0, 1, 1], [], []>} : vector<128x128xbf16>, vector<128x128xbf16>, vector<128x128xf32> -> vector<128x128xf32>
    %40 = vector.broadcast %38 : vector<1x128xf32> to vector<128x128xf32>
    %41 = arith.addf %39, %40 : vector<128x128xf32>
    %cst_29 = arith.constant 0.00999999977 : f32
    %42 = vector.broadcast %cst_29 : f32 to vector<128x128xf32>
    %43 = arith.mulf %42, %41 : vector<128x128xf32>
    %44 = arith.maximumf %41, %43 : vector<128x128xf32>
    %45 = arith.truncf %44 : vector<128x128xf32> to vector<128x128xbf16>
    %c0_30 = arith.constant 0 : index
    %c0_31 = arith.constant 0 : index
    %46 = vector.load %arg12[%c0_30, %c0_31] : memref<128x128xbf16, #tpu.memory_space<vmem>>, vector<128x128xbf16>
    %c0_32 = arith.constant 0 : index
    %c0_33 = arith.constant 0 : index
    %47 = vector.load %arg13[%c0_32, %c0_33] : memref<1x128xf32, #tpu.memory_space<vmem>>, vector<1x128xf32>
    %cst_34 = arith.constant dense<0.000000e+00> : vector<128x128xf32>
    %48 = tpu.matmul %45, %46, %cst_34 {dimension_numbers = #tpu.dot_dimension_numbers<[1], [0], [0], [1], [0, 0, 1, 1], [], []>} : vector<128x128xbf16>, vector<128x128xbf16>, vector<128x128xf32> -> vector<128x128xf32>
    %49 = vector.broadcast %47 : vector<1x128xf32> to vector<128x128xf32>
    %50 = arith.addf %48, %49 : vector<128x128xf32>
    %cst_35 = arith.constant 0.00999999977 : f32
    %51 = vector.broadcast %cst_35 : f32 to vector<128x128xf32>
    %52 = arith.mulf %51, %50 : vector<128x128xf32>
    %53 = arith.maximumf %50, %52 : vector<128x128xf32>
    %54 = arith.truncf %53 : vector<128x128xf32> to vector<128x128xbf16>
    %c0_36 = arith.constant 0 : index
    %c0_37 = arith.constant 0 : index
    %55 = vector.load %arg14[%c0_36, %c0_37] : memref<128x128xbf16, #tpu.memory_space<vmem>>, vector<128x128xbf16>
    %c0_38 = arith.constant 0 : index
    %c0_39 = arith.constant 0 : index
    %56 = vector.load %arg15[%c0_38, %c0_39] : memref<1x128xf32, #tpu.memory_space<vmem>>, vector<1x128xf32>
    %cst_40 = arith.constant dense<0.000000e+00> : vector<128x128xf32>
    %57 = tpu.matmul %54, %55, %cst_40 {dimension_numbers = #tpu.dot_dimension_numbers<[1], [0], [0], [1], [0, 0, 1, 1], [], []>} : vector<128x128xbf16>, vector<128x128xbf16>, vector<128x128xf32> -> vector<128x128xf32>
    %58 = vector.broadcast %56 : vector<1x128xf32> to vector<128x128xf32>
    %59 = arith.addf %57, %58 : vector<128x128xf32>
    %cst_41 = arith.constant 0.00999999977 : f32
    %60 = vector.broadcast %cst_41 : f32 to vector<128x128xf32>
    %61 = arith.mulf %60, %59 : vector<128x128xf32>
    %62 = arith.maximumf %59, %61 : vector<128x128xf32>
    %63 = arith.truncf %62 : vector<128x128xf32> to vector<128x128xbf16>
    %c0_42 = arith.constant 0 : index
    %c0_43 = arith.constant 0 : index
    %64 = vector.load %arg16[%c0_42, %c0_43] : memref<128x128xbf16, #tpu.memory_space<vmem>>, vector<128x128xbf16>
    %c0_44 = arith.constant 0 : index
    %c0_45 = arith.constant 0 : index
    %65 = vector.load %arg17[%c0_44, %c0_45] : memref<1x128xf32, #tpu.memory_space<vmem>>, vector<1x128xf32>
    %cst_46 = arith.constant dense<0.000000e+00> : vector<128x128xf32>
    %66 = tpu.matmul %63, %64, %cst_46 {dimension_numbers = #tpu.dot_dimension_numbers<[1], [0], [0], [1], [0, 0, 1, 1], [], []>} : vector<128x128xbf16>, vector<128x128xbf16>, vector<128x128xf32> -> vector<128x128xf32>
    %67 = vector.broadcast %65 : vector<1x128xf32> to vector<128x128xf32>
    %68 = arith.addf %66, %67 : vector<128x128xf32>
    %c0_47 = arith.constant 0 : index
    %c0_48 = arith.constant 0 : index
    %69 = vector.load %arg18[%c0_47, %c0_48] : memref<128x128xf32, #tpu.memory_space<vmem>>, vector<128x128xf32>
    tpu.vector_store %arg18[%c0_47, %c0_48], %68 {strides = array<i32>} : memref<128x128xf32, #tpu.memory_space<vmem>>, vector<128x128xf32>,
    return
  }
  func.func @transform_0(%arg0: i32) -> (i32, i32) {
    %c0_i32 = arith.constant 0 : i32
    %c0_i32_0 = arith.constant 0 : i32
    return %arg0, %c0_i32 : i32, i32
  }
  func.func @transform_1(%arg0: i32) -> (i32, i32) {
    %c0_i32 = arith.constant 0 : i32
    %c0_i32_0 = arith.constant 0 : i32
    %c0_i32_1 = arith.constant 0 : i32
    return %c0_i32, %c0_i32_0 : i32, i32
  }
  func.func @transform_2(%arg0: i32) -> (i32, i32) {
    %c0_i32 = arith.constant 0 : i32
    %c0_i32_0 = arith.constant 0 : i32
    %c0_i32_1 = arith.constant 0 : i32
    return %c0_i32, %c0_i32_0 : i32, i32
  }
  func.func @transform_3(%arg0: i32) -> (i32, i32) {
    %c0_i32 = arith.constant 0 : i32
    %c0_i32_0 = arith.constant 0 : i32
    %c0_i32_1 = arith.constant 0 : i32
    return %c0_i32, %c0_i32_0 : i32, i32
  }
  func.func @transform_4(%arg0: i32) -> (i32, i32) {
    %c0_i32 = arith.constant 0 : i32
    %c0_i32_0 = arith.constant 0 : i32
    %c0_i32_1 = arith.constant 0 : i32
    return %c0_i32, %c0_i32_0 : i32, i32
  }
  func.func @transform_5(%arg0: i32) -> (i32, i32) {
    %c0_i32 = arith.constant 0 : i32
    %c0_i32_0 = arith.constant 0 : i32
    %c0_i32_1 = arith.constant 0 : i32
    return %c0_i32, %c0_i32_0 : i32, i32
  }
  func.func @transform_6(%arg0: i32) -> (i32, i32) {
    %c0_i32 = arith.constant 0 : i32
    %c0_i32_0 = arith.constant 0 : i32
    %c0_i32_1 = arith.constant 0 : i32
    return %c0_i32, %c0_i32_0 : i32, i32
  }
  func.func @transform_7(%arg0: i32) -> (i32, i32) {
    %c0_i32 = arith.constant 0 : i32
    %c0_i32_0 = arith.constant 0 : i32
    %c0_i32_1 = arith.constant 0 : i32
    return %c0_i32, %c0_i32_0 : i32, i32
  }
  func.func @transform_8(%arg0: i32) -> (i32, i32) {
    %c0_i32 = arith.constant 0 : i32
    %c0_i32_0 = arith.constant 0 : i32
    %c0_i32_1 = arith.constant 0 : i32
    return %c0_i32, %c0_i32_0 : i32, i32
  }
  func.func @transform_9(%arg0: i32) -> (i32, i32) {
    %c0_i32 = arith.constant 0 : i32
    %c0_i32_0 = arith.constant 0 : i32
    %c0_i32_1 = arith.constant 0 : i32
    return %c0_i32, %c0_i32_0 : i32, i32
  }
  func.func @transform_10(%arg0: i32) -> (i32, i32) {
    %c0_i32 = arith.constant 0 : i32
    %c0_i32_0 = arith.constant 0 : i32
    %c0_i32_1 = arith.constant 0 : i32
    return %c0_i32, %c0_i32_0 : i32, i32
  }
  func.func @transform_11(%arg0: i32) -> (i32, i32) {
    %c0_i32 = arith.constant 0 : i32
    %c0_i32_0 = arith.constant 0 : i32
    %c0_i32_1 = arith.constant 0 : i32
    return %c0_i32, %c0_i32_0 : i32, i32
  }
  func.func @transform_12(%arg0: i32) -> (i32, i32) {
    %c0_i32 = arith.constant 0 : i32
    %c0_i32_0 = arith.constant 0 : i32
    %c0_i32_1 = arith.constant 0 : i32
    return %c0_i32, %c0_i32_0 : i32, i32
  }
  func.func @transform_13(%arg0: i32) -> (i32, i32) {
    %c0_i32 = arith.constant 0 : i32
    %c0_i32_0 = arith.constant 0 : i32
    %c0_i32_1 = arith.constant 0 : i32
    return %c0_i32, %c0_i32_0 : i32, i32
  }
  func.func @transform_14(%arg0: i32) -> (i32, i32) {
    %c0_i32 = arith.constant 0 : i32
    %c0_i32_0 = arith.constant 0 : i32
    %c0_i32_1 = arith.constant 0 : i32
    return %c0_i32, %c0_i32_0 : i32, i32
  }
  func.func @transform_15(%arg0: i32) -> (i32, i32) {
    %c0_i32 = arith.constant 0 : i32
    %c0_i32_0 = arith.constant 0 : i32
    %c0_i32_1 = arith.constant 0 : i32
    return %c0_i32, %c0_i32_0 : i32, i32
  }
  func.func @transform_16(%arg0: i32) -> (i32, i32) {
    %c0_i32 = arith.constant 0 : i32
    %c0_i32_0 = arith.constant 0 : i32
    %c0_i32_1 = arith.constant 0 : i32
    return %c0_i32, %c0_i32_0 : i32, i32
  }
  func.func @transform_17(%arg0: i32) -> (i32, i32) {
    %c0_i32 = arith.constant 0 : i32
    %c0_i32_0 = arith.constant 0 : i32
    return %arg0, %c0_i32 : i32, i32
  }
}

</mosaic_0001>

<bundles_post_ra>
// kernel: tpu_custom_call.1
= control target key start
LH: loop header
LB: loop body
LE: loop exit
PB: predicated region body
PF: predicated region fallthrough
CT: control target
= control target key end

     0   :  { %s3116_s0 = inlined_call_operand.hbm [shape: bf16[128,128], index: 0, kind: input, shape index: {}]   ;;  %s3117_s1 = inlined_call_operand.hbm [shape: bf16[128,128], index: 1, kind: input, shape index: {}]   ;;  %s3118_s2 = inlined_call_operand.vmem [shape: f32[1,128], index: 2, kind: input, shape index: {}]   ;;  %s3119_s3 = inlined_call_operand.hbm [shape: bf16[128,128], index: 3, kind: input, shape index: {}]   ;;  %s3120_s4 = inlined_call_operand.vmem [shape: f32[1,128], index: 4, kind: input, shape index: {}]   ;;  %s3121_s5 = inlined_call_operand.hbm [shape: bf16[128,128], index: 5, kind: input, shape index: {}]   ;;  %s3122_s6 = inlined_call_operand.vmem [shape: f32[1,128], index: 6, kind: input, shape index: {}]   ;;  %s3123_s7 = inlined_call_operand.hbm [shape: bf16[128,128], index: 7, kind: input, shape index: {}]   ;;  %s3124_s8 = inlined_call_operand.vmem [shape: f32[1,128], index: 8, kind: input, shape index: {}]   ;;  %s3125_s9 = inlined_call_operand.hbm [shape: bf16[128,128], index: 9, kind: input, shape index: {}]   ;;  %s3126_s10 = inlined_call_operand.vmem [shape: f32[1,128], index: 10, kind: input, shape index: {}]   ;;  %s3127_s11 = inlined_call_operand.hbm [shape: bf16[128,128], index: 11, kind: input, shape index: {}]   ;;  %s3128_s12 = inlined_call_operand.vmem [shape: f32[1,128], index: 12, kind: input, shape index: {}]   ;;  %s3129_s13 = inlined_call_operand.hbm [shape: bf16[128,128], index: 13, kind: input, shape index: {}]   ;;  %s3130_s14 = inlined_call_operand.vmem [shape: f32[1,128], index: 14, kind: input, shape index: {}]   ;;  %s3131_s15 = inlined_call_operand.hbm [shape: bf16[128,128], index: 15, kind: input, shape index: {}]   ;;  %s3132_s16 = inlined_call_operand.vmem [shape: f32[1,128], index: 16, kind: input, shape index: {}]   ;;  %s3133_s17 = inlined_call_operand.hbm [shape: f32[128,128], index: 17, kind: output, shape index: {}]  }
   0x1   :  { %3137 = sst [smem:[#allocation24_spill]] %s3116_s0 }
   0x2   :  { %3138 = sst [smem:[#allocation25_spill]] %s3117_s1 }
   0x3   :  { %3139 = sst [smem:[#allocation26_spill]] %s3133_s17 }
   0x4   :  { %22 = vsyncpa [#allocation3], 0 }
   0x5   :  { %23 = vsyncpa [#allocation6], 0 }
   0x6   :  { %24 = vsyncpa [#allocation9], 0 }
   0x7   :  { %25 = vsyncpa [#allocation12], 0 }
   0x8   :  { %26 = vsyncpa [#allocation15], 0 }
   0x9   :  { %27 = vsyncpa [#allocation4], 0  ;;  %s2687_s24 = smov [#allocation5]   ;;  %s2688_s26 = smov [#allocation8]  }
   0xa   :  { %s45_s25 = sshll.u32 %s2687_s24, 4  ;;  %s73_s27 = sshll.u32 %s2688_s26, 4  ;;  %s46_s25 = int_to_ptr.vmem [resolvable:$true] %s45_s25  ;;  %s2791_s27 = int_to_ptr.vmem [resolvable:$true] %s73_s27 }
   0xb   :  { %s3140_s0 = sld [smem:[#allocation25_spill]] }
  0x11   :  { %s2455_s30 = scalar_lea.hbm %s3140_s0, 1024 }
  0x12   :  { %p2456_p0 = scmp.ne.s32.totalorder %s3140_s0, %s2455_s30  ;;  %p2459_p1 = scmp.lt.u32.totalorder %s2455_s30, %s3140_s0 }
  0x14   :  { %p2461_p2 = pnand %p2459_p1, %p2456_p0 }
  0x16   :  { %2464 = shalt.err (!%p2461_p2)
}
  0x17   :  { %s2465_s21 = scalar_lea.vmem %s46_s25, 1024  ;;  %p2470_p4 = scmp.lt.s32.totalorder %s46_s25, %s46_s25 }
  0x18   :  { %p2466_p3 = scmp.ne.s32.totalorder %s46_s25, %s2465_s21  ;;  %p2471_p5 = scmp.lt.s32.totalorder %s2465_s21, %s2465_s21 }
  0x1a   :  { %p2472_p6 = por %p2471_p5, %p2470_p4 }
  0x1c   :  { %p2473_p7 = pnand %p2472_p6, %p2466_p3 }
  0x1e   :  { %2476 = shalt.err (!%p2473_p7)
}
  0x1f   :  { %s2689_s22 = smov 64   ;;  %s2690_s23 = smov 4  }
  0x20   :  { %51 = dma.hbm_to_vmem [thread:$0]  %s3140_s0, 1024, %s46_s25, [#allocation6], %s2689_s22, %s2689_s22, %s2690_s23  }
  0x21   :  { %s2477_s30 = scalar_lea.hbm %s3121_s5, 1024 }
  0x22   :  { %p2478_p8 = scmp.ne.s32.totalorder %s3121_s5, %s2477_s30  ;;  %p2481_p9 = scmp.lt.u32.totalorder %s2477_s30, %s3121_s5 }
  0x24   :  { %p2483_p10 = pnand %p2481_p9, %p2478_p8 }
  0x26   :  { %2486 = shalt.err (!%p2483_p10)
}
  0x27   :  { %s2487_s21 = scalar_lea.vmem %s2791_s27, 1024  ;;  %p2492_p12 = scmp.lt.s32.totalorder %s2791_s27, %s2791_s27 }
  0x28   :  { %p2488_p11 = scmp.ne.s32.totalorder %s2791_s27, %s2487_s21  ;;  %p2493_p13 = scmp.lt.s32.totalorder %s2487_s21, %s2487_s21 }
  0x2a   :  { %p2494_p0 = por %p2493_p13, %p2492_p12 }
  0x2c   :  { %p2495_p1 = pnand %p2494_p0, %p2488_p11 }
  0x2e   :  { %2498 = shalt.err (!%p2495_p1)
}
  0x2f   :  { %79 = dma.hbm_to_vmem [thread:$0]  %s3121_s5, 1024, %s2791_s27, [#allocation9], %s2689_s22, %s2689_s22, %s2690_s23  }
  0x30   :  { %s2691_s24 = smov [#allocation11]   ;;  %s2692_s28 = smov [#allocation14]  }
  0x31   :  { %s101_s26 = sshll.u32 %s2691_s24, 4  ;;  %s129_s29 = sshll.u32 %s2692_s28, 4  ;;  %s102_s26 = int_to_ptr.vmem [resolvable:$true] %s101_s26  ;;  %s2828_s29 = int_to_ptr.vmem [resolvable:$true] %s129_s29 }
  0x32   :  { %s2499_s19 = scalar_lea.hbm %s3125_s9, 1024 }
  0x33   :  { %p2500_p2 = scmp.ne.s32.totalorder %s3125_s9, %s2499_s19  ;;  %p2503_p3 = scmp.lt.u32.totalorder %s2499_s19, %s3125_s9 }
  0x35   :  { %p2505_p4 = pnand %p2503_p3, %p2500_p2 }
  0x37   :  { %2508 = shalt.err (!%p2505_p4)
}
  0x38   :  { %s2509_s5 = scalar_lea.vmem %s102_s26, 1024  ;;  %p2514_p6 = scmp.lt.s32.totalorder %s102_s26, %s102_s26 }
  0x39   :  { %p2510_p5 = scmp.ne.s32.totalorder %s102_s26, %s2509_s5  ;;  %p2515_p7 = scmp.lt.s32.totalorder %s2509_s5, %s2509_s5 }
  0x3b   :  { %p2516_p8 = por %p2515_p7, %p2514_p6 }
  0x3d   :  { %p2517_p9 = pnand %p2516_p8, %p2510_p5 }
  0x3f   :  { %2520 = shalt.err (!%p2517_p9)
}
  0x40   :  { %107 = dma.hbm_to_vmem [thread:$0]  %s3125_s9, 1024, %s102_s26, [#allocation12], %s2689_s22, %s2689_s22, %s2690_s23  }
  0x41   :  { %s2521_s17 = scalar_lea.hbm %s3129_s13, 1024 }
  0x42   :  { %p2522_p10 = scmp.ne.s32.totalorder %s3129_s13, %s2521_s17  ;;  %p2525_p11 = scmp.lt.u32.totalorder %s2521_s17, %s3129_s13 }
  0x44   :  { %p2527_p12 = pnand %p2525_p11, %p2522_p10 }
  0x46   :  { %2530 = shalt.err (!%p2527_p12)
}
  0x47   :  { %s2531_s1 = scalar_lea.vmem %s2828_s29, 1024  ;;  %p2536_p0 = scmp.lt.s32.totalorder %s2828_s29, %s2828_s29 }
  0x48   :  { %p2532_p13 = scmp.ne.s32.totalorder %s2828_s29, %s2531_s1  ;;  %p2537_p1 = scmp.lt.s32.totalorder %s2531_s1, %s2531_s1 }
  0x4a   :  { %p2538_p2 = por %p2537_p1, %p2536_p0 }
  0x4c   :  { %p2539_p3 = pnand %p2538_p2, %p2532_p13 }
  0x4e   :  { %2542 = shalt.err (!%p2539_p3)
}
  0x4f   :  { %135 = dma.hbm_to_vmem [thread:$0]  %s3129_s13, 1024, %s2828_s29, [#allocation15], %s2689_s22, %s2689_s22, %s2690_s23  }
  0x50   :  { %s2693_s20 = smov [#allocation2]   ;;  %s2694_s5 = smov [#allocation7]  }
  0x51   :  { %s33_s21 = sshll.u32 %s2693_s20, 4  ;;  %s59_s27 = sshll.u32 %s2694_s5, 4  ;;  %s34_s21 = int_to_ptr.vmem [resolvable:$true] %s33_s21  ;;  %s2865_s27 = int_to_ptr.vmem [resolvable:$true] %s59_s27 }
  0x52   :  { %s3141_s24 = sld [smem:[#allocation24_spill]] }
  0x58   :  { %s2543_s17 = scalar_lea.hbm %s3141_s24, 1024 }
  0x59   :  { %p2544_p4 = scmp.ne.s32.totalorder %s3141_s24, %s2543_s17  ;;  %p2547_p5 = scmp.lt.u32.totalorder %s2543_s17, %s3141_s24 }
  0x5b   :  { %p2549_p6 = pnand %p2547_p5, %p2544_p4 }
  0x5d   :  { %2552 = shalt.err (!%p2549_p6)
}
  0x5e   :  { %s2553_s13 = scalar_lea.vmem %s34_s21, 1024  ;;  %p2558_p8 = scmp.lt.s32.totalorder %s34_s21, %s34_s21 }
  0x5f   :  { %p2554_p7 = scmp.ne.s32.totalorder %s34_s21, %s2553_s13  ;;  %p2559_p9 = scmp.lt.s32.totalorder %s2553_s13, %s2553_s13 }
  0x61   :  { %p2560_p10 = por %p2559_p9, %p2558_p8 }
  0x63   :  { %p2561_p11 = pnand %p2560_p10, %p2554_p7 }
  0x65   :  { %2564 = shalt.err (!%p2561_p11)
}
  0x66   :  { %39 = dma.hbm_to_vmem [thread:$0]  %s3141_s24, 1024, %s34_s21, [#allocation3], %s2689_s22, %s2689_s22, %s2690_s23  }
  0x67   :  { %s2565_s20 = scalar_lea.hbm %s3119_s3, 1024 }
  0x68   :  { %p2566_p12 = scmp.ne.s32.totalorder %s3119_s3, %s2565_s20  ;;  %p2569_p13 = scmp.lt.u32.totalorder %s2565_s20, %s3119_s3 }
  0x6a   :  { %p2571_p0 = pnand %p2569_p13, %p2566_p12 }
  0x6c   :  { %2574 = shalt.err (!%p2571_p0)
}
  0x6d   :  { %s2575_s28 = scalar_lea.vmem %s2865_s27, 1024  ;;  %p2580_p2 = scmp.lt.s32.totalorder %s2865_s27, %s2865_s27 }
  0x6e   :  { %p2576_p1 = scmp.ne.s32.totalorder %s2865_s27, %s2575_s28  ;;  %p2581_p3 = scmp.lt.s32.totalorder %s2575_s28, %s2575_s28 }
  0x70   :  { %p2582_p4 = por %p2581_p3, %p2580_p2 }
  0x72   :  { %p2583_p5 = pnand %p2582_p4, %p2576_p1 }
  0x74   :  { %2586 = shalt.err (!%p2583_p5)
}
  0x75   :  { %65 = dma.hbm_to_vmem [thread:$0]  %s3119_s3, 1024, %s2865_s27, [#allocation6], %s2689_s22, %s2689_s22, %s2690_s23  }
  0x76   :  { %s2695_s30 = smov [#allocation10]   ;;  %s2696_s19 = smov [#allocation13]  }
  0x77   :  { %s87_s18 = sshll.u32 %s2695_s30, 4  ;;  %s115_s13 = sshll.u32 %s2696_s19, 4  ;;  %s88_s18 = int_to_ptr.vmem [resolvable:$true] %s87_s18  ;;  %s2902_s13 = int_to_ptr.vmem [resolvable:$true] %s115_s13 }
  0x78   :  { %s2587_s9 = scalar_lea.hbm %s3123_s7, 1024 }
  0x79   :  { %p2588_p6 = scmp.ne.s32.totalorder %s3123_s7, %s2587_s9  ;;  %p2591_p7 = scmp.lt.u32.totalorder %s2587_s9, %s3123_s7 }
  0x7b   :  { %p2593_p8 = pnand %p2591_p7, %p2588_p6 }
  0x7d   :  { %2596 = shalt.err (!%p2593_p8)
}
  0x7e   :  { %s2597_s3 = scalar_lea.vmem %s88_s18, 1024  ;;  %p2602_p10 = scmp.lt.s32.totalorder %s88_s18, %s88_s18 }
  0x7f   :  { %p2598_p9 = scmp.ne.s32.totalorder %s88_s18, %s2597_s3  ;;  %p2603_p11 = scmp.lt.s32.totalorder %s2597_s3, %s2597_s3 }
  0x81   :  { %p2604_p12 = por %p2603_p11, %p2602_p10 }
  0x83   :  { %p2605_p13 = pnand %p2604_p12, %p2598_p9 }
  0x85   :  { %2608 = shalt.err (!%p2605_p13)
}
  0x86   :  { %93 = dma.hbm_to_vmem [thread:$0]  %s3123_s7, 1024, %s88_s18, [#allocation9], %s2689_s22, %s2689_s22, %s2690_s23  }
  0x87   :  { %s2609_s21 = scalar_lea.hbm %s3127_s11, 1024 }
  0x88   :  { %p2610_p0 = scmp.ne.s32.totalorder %s3127_s11, %s2609_s21  ;;  %p2613_p1 = scmp.lt.u32.totalorder %s2609_s21, %s3127_s11 }
  0x8a   :  { %p2615_p2 = pnand %p2613_p1, %p2610_p0 }
  0x8c   :  { %2618 = shalt.err (!%p2615_p2)
}
  0x8d   :  { %s2619_s1 = scalar_lea.vmem %s2902_s13, 1024  ;;  %p2624_p4 = scmp.lt.s32.totalorder %s2902_s13, %s2902_s13 }
  0x8e   :  { %p2620_p3 = scmp.ne.s32.totalorder %s2902_s13, %s2619_s1  ;;  %p2625_p5 = scmp.lt.s32.totalorder %s2619_s1, %s2619_s1 }
  0x90   :  { %p2626_p6 = por %p2625_p5, %p2624_p4 }
  0x92   :  { %p2627_p7 = pnand %p2626_p6, %p2620_p3 }
  0x94   :  { %2630 = shalt.err (!%p2627_p7)
}
  0x95   :  { %121 = dma.hbm_to_vmem [thread:$0]  %s3127_s11, 1024, %s2902_s13, [#allocation12], %s2689_s22, %s2689_s22, %s2690_s23  }
  0x96   :  { %s2697_s9 = smov [#allocation16]   ;;  %s2631_s25 = scalar_lea.hbm %s3131_s15, 1024 }
  0x97   :  { %s143_s26 = sshll.u32 %s2697_s9, 4  ;;  %p2632_p8 = scmp.ne.s32.totalorder %s3131_s15, %s2631_s25  ;;  %s144_s26 = int_to_ptr.vmem [resolvable:$true] %s143_s26 }
  0x98   :  { %p2635_p9 = scmp.lt.u32.totalorder %s2631_s25, %s3131_s15 }
  0x9a   :  { %p2637_p10 = pnand %p2635_p9, %p2632_p8 }
  0x9c   :  { %2640 = shalt.err (!%p2637_p10)
}
  0x9d   :  { %s2641_s28 = scalar_lea.vmem %s144_s26, 1024  ;;  %p2646_p12 = scmp.lt.s32.totalorder %s144_s26, %s144_s26 }
  0x9e   :  { %p2642_p11 = scmp.ne.s32.totalorder %s144_s26, %s2641_s28  ;;  %p2647_p13 = scmp.lt.s32.totalorder %s2641_s28, %s2641_s28 }
  0xa0   :  { %p2648_p0 = por %p2647_p13, %p2646_p12 }
  0xa2   :  { %p2649_p1 = pnand %p2648_p0, %p2642_p11 }
  0xa4   :  { %2652 = shalt.err (!%p2649_p1)
}
  0xa5   :  { %149 = dma.hbm_to_vmem [thread:$0]  %s3131_s15, 1024, %s144_s26, [#allocation15], %s2689_s22, %s2689_s22, %s2690_s23  }
  0xa6   :  { %2675 = dma.done.wait [#allocation3], 1024  }
  0xa7   :  { %2676 = vsyncadd [#allocation3], 4294966272 }
  0xa8   :  { %2677 = dma.done.wait [#allocation6], 2048  }
  0xa9   :  { %2678 = vsyncadd [#allocation6], 4294965248 }
  0xaa   :  { %2679 = dma.done.wait [#allocation9], 2048  }
  0xab   :  { %2680 = vsyncadd [#allocation9], 4294965248 }
  0xac   :  { %2681 = dma.done.wait [#allocation12], 2048  }
  0xad   :  { %2682 = vsyncadd [#allocation12], 4294965248 }
  0xae   :  { %2683 = dma.done.wait [#allocation15], 2048  }
  0xaf   :  { %2684 = vsyncadd [#allocation15], 4294965248  ;;  %v2383_v0 = vld [vmem:[#allocation5] sm:$0xff]   ;;  %v2384_v1 = vld [vmem:[#allocation5 + $0x8] sm:$0xff]  }
  0xb0   :  { %2113 = vmatprep.subr.bf16.mxu0 %v2383_v0  ;;  %v2385_v2 = vld [vmem:[#allocation5 + $0x10] sm:$0xff]   ;;  %v2386_v3 = vld [vmem:[#allocation5 + $0x18] sm:$0xff]   ;;  %v2391_v4 = vld [vmem:[#allocation2] sm:$0xff]  }
  0xb1   :  { %2114 = vmatpush3.bf16.msra.mxu0 %v2383_v0  ;;  %2129 = vmatprep.mubr.bf16.mxu0 %v2391_v4  ;;  %v2387_v5 = vld [vmem:[#allocation5 + $0x20] sm:$0xff]   ;;  %v2388_v6 = vld [vmem:[#allocation5 + $0x28] sm:$0xff]   ;;  %v2389_v9 = vld [vmem:[#allocation5 + $0x30] sm:$0xff]  }
  0xb2   :  { %2115 = vmatprep.subr.bf16.mxu0 %v2384_v1  ;;  %v2399_v7 = vld [vmem:[#allocation7] sm:$0xff]   ;;  %v2400_v8 = vld [vmem:[#allocation7 + $0x8] sm:$0xff]   ;;  %v2401_v10 = vld [vmem:[#allocation7 + $0x10] sm:$0xff]  }
  0xb3   :  { %2145 = vmatprep.subr.bf16.mxu1 %v2399_v7  ;;  %v2390_v11 = vld [vmem:[#allocation5 + $0x38] sm:$0xff]   ;;  %v2403_v13 = vld [vmem:[#allocation7 + $0x20] sm:$0xff]   ;;  %v2392_v14 = vld [vmem:[#allocation2 + $0x8] sm:$0xff]  }
  0xb4   :  { %2146 = vmatpush3.bf16.msra.mxu1 %v2399_v7  ;;  %v2402_v12 = vld [vmem:[#allocation7 + $0x18] sm:$0xff]   ;;  %v2393_v15 = vld [vmem:[#allocation2 + $0x10] sm:$0xff]   ;;  %v2395_v17 = vld [vmem:[#allocation2 + $0x20] sm:$0xff]  }
  0xb5   :  { %2116 = vmatpush3.bf16.msra.mxu0 %v2384_v1  ;;  %2147 = vmatprep.subr.bf16.mxu1 %v2400_v8  ;;  %v2394_v16 = vld [vmem:[#allocation2 + $0x18] sm:$0xff]   ;;  %v2396_v18 = vld [vmem:[#allocation2 + $0x28] sm:$0xff]   ;;  %v2397_v19 = vld [vmem:[#allocation2 + $0x30] sm:$0xff]  }
  0xb6   :  { %2117 = vmatprep.subr.bf16.mxu0 %v2385_v2  ;;  %v2398_v20 = vld [vmem:[#allocation2 + $0x38] sm:$0xff]   ;;  %v2404_v21 = vld [vmem:[#allocation7 + $0x28] sm:$0xff]   ;;  %v2405_v22 = vld [vmem:[#allocation7 + $0x30] sm:$0xff]  }
  0xb7   :  { %v2406_v23 = vld [vmem:[#allocation7 + $0x38] sm:$0xff]   ;;  %v2407_v24 = vld [vmem:[#allocation8] sm:$0xff]   ;;  %v2408_v25 = vld [vmem:[#allocation8 + $0x8] sm:$0xff]  }
  0xb8   :  { %2148 = vmatpush3.bf16.msra.mxu1 %v2400_v8  ;;  %v2409_v26 = vld [vmem:[#allocation8 + $0x10] sm:$0xff]   ;;  %v2410_v27 = vld [vmem:[#allocation8 + $0x18] sm:$0xff]   ;;  %v2411_v28 = vld [vmem:[#allocation8 + $0x20] sm:$0xff]  }
  0xb9   :  { %2118 = vmatpush3.bf16.msra.mxu0 %v2385_v2  ;;  %2149 = vmatprep.subr.bf16.mxu1 %v2401_v10  ;;  %v2957_v29 = vld [vmem:[%s3118_s2] ss:$0 sm:$0xff] }
  0xba   :  { %2119 = vmatprep.subr.bf16.mxu0 %v2386_v3 }
  0xbc   :  { %2150 = vmatpush3.bf16.msra.mxu1 %v2401_v10 }
  0xbd   :  { %2120 = vmatpush3.bf16.msra.mxu0 %v2386_v3  ;;  %2151 = vmatprep.subr.bf16.mxu1 %v2402_v12 }
  0xbe   :  { %2121 = vmatprep.subr.bf16.mxu0 %v2387_v5 }
  0xc0   :  { %2152 = vmatpush3.bf16.msra.mxu1 %v2402_v12 }
  0xc1   :  { %2122 = vmatpush3.bf16.msra.mxu0 %v2387_v5  ;;  %2153 = vmatprep.subr.bf16.mxu1 %v2403_v13 }
  0xc2   :  { %2123 = vmatprep.subr.bf16.mxu0 %v2388_v6 }
  0xc4   :  { %2154 = vmatpush3.bf16.msra.mxu1 %v2403_v13 }
  0xc5   :  { %2124 = vmatpush3.bf16.msra.mxu0 %v2388_v6  ;;  %2155 = vmatprep.subr.bf16.mxu1 %v2404_v21 }
  0xc6   :  { %2125 = vmatprep.subr.bf16.mxu0 %v2389_v9 }
  0xc8   :  { %2156 = vmatpush3.bf16.msra.mxu1 %v2404_v21 }
  0xc9   :  { %2126 = vmatpush3.bf16.msra.mxu0 %v2389_v9  ;;  %2157 = vmatprep.subr.bf16.mxu1 %v2405_v22 }
  0xca   :  { %2127 = vmatprep.subr.bf16.mxu0 %v2390_v11 }
  0xcc   :  { %2158 = vmatpush3.bf16.msra.mxu1 %v2405_v22 }
  0xcd   :  { %2128 = vmatpush3.bf16.msra.mxu0 %v2390_v11  ;;  %2159 = vmatprep.subr.bf16.mxu1 %v2406_v23 }
  0xce   :  { %2177 = vmatprep.subr.bf16.mxu0 %v2407_v24 }
  0xd0   :  { %2130 = vmatmul.mubr.bf16.vlgmr.msra.gmra.mrb[0].mxu0 %v2392_v14  ;;  %2160 = vmatpush3.bf16.msra.mxu1 %v2406_v23 }
  0xd1   :  { %2133 = vmatprep.mubr.bf16.mxu0 %v2393_v15  ;;  %2178 = vmatpush3.bf16.msra.mxu0 %v2407_v24 }
  0xd2   :  { %2179 = vmatprep.subr.bf16.mxu0 %v2408_v25 }
  0xd5   :  { %2180 = vmatpush3.bf16.msra.mxu0 %v2408_v25 }
  0xd6   :  { %2181 = vmatprep.subr.bf16.mxu0 %v2409_v26 }
  0xd8   :  { %2134 = vmatmul.mubr.bf16.gmra.mrb[4].mxu0 %v2394_v16 }
  0xd9   :  { %2137 = vmatprep.mubr.bf16.mxu0 %v2395_v17  ;;  %2182 = vmatpush3.bf16.msra.mxu0 %v2409_v26 }
  0xda   :  { %2183 = vmatprep.subr.bf16.mxu0 %v2410_v27 }
  0xdd   :  { %2184 = vmatpush3.bf16.msra.mxu0 %v2410_v27 }
  0xde   :  { %2185 = vmatprep.subr.bf16.mxu0 %v2411_v28 }
  0xe0   :  { %2138 = vmatmul.mubr.bf16.gmra.mrb[8].mxu0 %v2396_v18 }
  0xe1   :  { %2141 = vmatprep.mubr.bf16.mxu0 %v2397_v19  ;;  %2186 = vmatpush3.bf16.msra.mxu0 %v2411_v28 }
  0xe8   :  { %2142 = vmatmul.mubr.bf16.gmra.mrb[12].mxu0 %v2398_v20 }
 0x1a3   :  { %v2131_v30 = vpop.f32.mrb[0].mxu0 }
 0x1a4   :  { %v358_v31 = vadd.f32 %v2131_v30, %v2957_v29  ;;  %v349_v32 = vpop.f32.mrb[1].mxu0 }
 0x1a5   :  { %v350_v33 = vadd.f32 %v2957_v29, %v349_v32  ;;  %v2132_v34 = vpop.f32.mrb[2].mxu0 }
 0x1a6   :  { %v414_v35 = vmul.f32 0.01, %v358_v31  ;;  %v361_v36 = vadd.f32 %v2132_v34, %v2957_v29  ;;  %v352_v37 = vpop.f32.mrb[3].mxu0 }
 0x1a7   :  { %v412_v38 = vmul.f32 0.01, %v350_v33  ;;  %v353_v39 = vadd.f32 %v2957_v29, %v352_v37 }
 0x1a8   :  { %v415_v40 = vmul.f32 0.01, %v361_v36  ;;  %v430_v42 = vmax.f32 %v358_v31, %v414_v35 }
 0x1a9   :  { %v413_v41 = vmul.f32 0.01, %v353_v39  ;;  %v428_v45 = vmax.f32 %v350_v33, %v412_v38 }
 0x1aa   :  { %v431_v43 = vmax.f32 %v361_v36, %v415_v40  ;;  %v2413_v40 = vld [vmem:[#allocation8 + $0x30] sm:$0xff]  }
 0x1ab   :  { %v2135_v44 = vpop.f32.mrb[4].mxu0  ;;  %v429_v46 = vmax.f32 %v353_v39, %v413_v41  ;;  %v2412_v39 = vld [vmem:[#allocation8 + $0x28] sm:$0xff]   ;;  %v2414_v41 = vld [vmem:[#allocation8 + $0x38] sm:$0xff]  }
 0x1ac   :  { %v374_v47 = vadd.f32 %v2135_v44, %v2957_v29  ;;  %v365_v48 = vpop.f32.mrb[5].mxu0  ;;  %v445_v49 = vpack.c.bf16 %v431_v43, %v430_v42  ;;  %2187 = vmatprep.subr.bf16.mxu0 %v2412_v39  ;;  %v2416_v42 = vld [vmem:[#allocation10 + $0x8] sm:$0xff]   ;;  %v2417_v43 = vld [vmem:[#allocation10 + $0x10] sm:$0xff]   ;;  %v2418_v44 = vld [vmem:[#allocation10 + $0x18] sm:$0xff]  }
 0x1ad   :  { %v366_v50 = vadd.f32 %v2957_v29, %v365_v48  ;;  %v2136_v51 = vpop.f32.mrb[6].mxu0  ;;  %v444_v52 = vpack.c.bf16 %v429_v46, %v428_v45  ;;  %2188 = vmatpush3.bf16.msra.mxu0 %v2412_v39  ;;  %v2419_v45 = vld [vmem:[#allocation10 + $0x20] sm:$0xff]  }
 0x1ae   :  { %v418_v53 = vmul.f32 0.01, %v374_v47  ;;  %v377_v54 = vadd.f32 %v2136_v51, %v2957_v29  ;;  %v368_v55 = vpop.f32.mrb[7].mxu0  ;;  %2189 = vmatprep.subr.bf16.mxu0 %v2413_v40  ;;  %v2978_v46 = vld [vmem:[%s3120_s4] ss:$0 sm:$0xff] }
 0x1af   :  { %v416_v56 = vmul.f32 0.01, %v366_v50  ;;  %v369_v57 = vadd.f32 %v2957_v29, %v368_v55  ;;  %2161 = vmatprep.mubr.bf16.mxu1 %v444_v52 }
 0x1b0   :  { %v419_v58 = vmul.f32 0.01, %v377_v54  ;;  %2162 = vmatmul.mubr.bf16.vlgmr.msra.gmra.mrb[0].mxu1 %v445_v49  ;;  %v434_v60 = vmax.f32 %v374_v47, %v418_v53 }
 0x1b1   :  { %v417_v59 = vmul.f32 0.01, %v369_v57  ;;  %v432_v62 = vmax.f32 %v366_v50, %v416_v56  ;;  %2190 = vmatpush3.bf16.msra.mxu0 %v2413_v40 }
 0x1b2   :  { %v435_v61 = vmax.f32 %v377_v54, %v419_v58  ;;  %2191 = vmatprep.subr.bf16.mxu0 %v2414_v41 }
 0x1b3   :  { %v433_v63 = vmax.f32 %v369_v57, %v417_v59  ;;  %v2139_v0 = vpop.f32.mrb[8].mxu0 }
 0x1b4   :  { %v390_v1 = vadd.f32 %v2139_v0, %v2957_v29  ;;  %v381_v2 = vpop.f32.mrb[9].mxu0  ;;  %v447_v3 = vpack.c.bf16 %v435_v61, %v434_v60 }
 0x1b5   :  { %v382_v4 = vadd.f32 %v2957_v29, %v381_v2  ;;  %v2140_v5 = vpop.f32.mrb[10].mxu0  ;;  %v446_v6 = vpack.c.bf16 %v433_v63, %v432_v62  ;;  %2192 = vmatpush3.bf16.msra.mxu0 %v2414_v41 }
 0x1b6   :  { %v422_v7 = vmul.f32 0.01, %v390_v1  ;;  %v393_v8 = vadd.f32 %v2140_v5, %v2957_v29  ;;  %v384_v9 = vpop.f32.mrb[11].mxu0 }
 0x1b7   :  { %v420_v10 = vmul.f32 0.01, %v382_v4  ;;  %v385_v11 = vadd.f32 %v2957_v29, %v384_v9  ;;  %2165 = vmatprep.mubr.bf16.mxu1 %v446_v6 }
 0x1b8   :  { %v423_v12 = vmul.f32 0.01, %v393_v8  ;;  %2166 = vmatmul.mubr.bf16.gmra.mrb[4].mxu1 %v447_v3  ;;  %v438_v14 = vmax.f32 %v390_v1, %v422_v7 }
 0x1b9   :  { %v421_v13 = vmul.f32 0.01, %v385_v11  ;;  %v436_v16 = vmax.f32 %v382_v4, %v420_v10 }
 0x1ba   :  { %v439_v15 = vmax.f32 %v393_v8, %v423_v12 }
 0x1bb   :  { %v437_v17 = vmax.f32 %v385_v11, %v421_v13  ;;  %v2143_v18 = vpop.f32.mrb[12].mxu0 }
 0x1bc   :  { %v406_v19 = vadd.f32 %v2143_v18, %v2957_v29  ;;  %v397_v20 = vpop.f32.mrb[13].mxu0  ;;  %v449_v21 = vpack.c.bf16 %v439_v15, %v438_v14 }
 0x1bd   :  { %v398_v22 = vadd.f32 %v2957_v29, %v397_v20  ;;  %v2144_v23 = vpop.f32.mrb[14].mxu0  ;;  %v448_v24 = vpack.c.bf16 %v437_v17, %v436_v16 }
 0x1be   :  { %v426_v25 = vmul.f32 0.01, %v406_v19  ;;  %v409_v26 = vadd.f32 %v2144_v23, %v2957_v29  ;;  %v400_v27 = vpop.f32.mrb[15].mxu0 }
 0x1bf   :  { %v424_v28 = vmul.f32 0.01, %v398_v22  ;;  %v401_v30 = vadd.f32 %v2957_v29, %v400_v27  ;;  %2169 = vmatprep.mubr.bf16.mxu1 %v448_v24  ;;  %v2415_v29 = vld [vmem:[#allocation10] sm:$0xff]  }
 0x1c0   :  { %v427_v31 = vmul.f32 0.01, %v409_v26  ;;  %2170 = vmatmul.mubr.bf16.gmra.mrb[8].mxu1 %v449_v21  ;;  %v442_v33 = vmax.f32 %v406_v19, %v426_v25  ;;  %2209 = vmatprep.subr.bf16.mxu1 %v2415_v29 }
 0x1c1   :  { %v425_v32 = vmul.f32 0.01, %v401_v30  ;;  %v440_v35 = vmax.f32 %v398_v22, %v424_v28  ;;  %2210 = vmatpush3.bf16.msra.mxu1 %v2415_v29 }
 0x1c2   :  { %v443_v34 = vmax.f32 %v409_v26, %v427_v31  ;;  %2211 = vmatprep.subr.bf16.mxu1 %v2416_v42 }
 0x1c3   :  { %v441_v36 = vmax.f32 %v401_v30, %v425_v32 }
 0x1c4   :  { %v451_v37 = vpack.c.bf16 %v443_v34, %v442_v33 }
 0x1c5   :  { %v450_v38 = vpack.c.bf16 %v441_v36, %v440_v35  ;;  %2212 = vmatpush3.bf16.msra.mxu1 %v2416_v42 }
 0x1c6   :  { %2213 = vmatprep.subr.bf16.mxu1 %v2417_v43 }
 0x1c7   :  { %2173 = vmatprep.mubr.bf16.mxu1 %v450_v38 }
 0x1c8   :  { %2174 = vmatmul.mubr.bf16.gmra.mrb[12].mxu1 %v451_v37 }
 0x1c9   :  { %2214 = vmatpush3.bf16.msra.mxu1 %v2417_v43 }
 0x1ca   :  { %2215 = vmatprep.subr.bf16.mxu1 %v2418_v44 }
 0x1cd   :  { %2216 = vmatpush3.bf16.msra.mxu1 %v2418_v44 }
 0x1ce   :  { %2217 = vmatprep.subr.bf16.mxu1 %v2419_v45 }
 0x1d1   :  { %2218 = vmatpush3.bf16.msra.mxu1 %v2419_v45 }
 0x283   :  { %v2163_v47 = vpop.f32.mrb[0].mxu1 }
 0x284   :  { %v566_v48 = vadd.f32 %v2163_v47, %v2978_v46  ;;  %v557_v49 = vpop.f32.mrb[1].mxu1 }
 0x285   :  { %v558_v50 = vadd.f32 %v2978_v46, %v557_v49  ;;  %v2164_v51 = vpop.f32.mrb[2].mxu1 }
 0x286   :  { %v622_v52 = vmul.f32 0.01, %v566_v48  ;;  %v569_v53 = vadd.f32 %v2164_v51, %v2978_v46  ;;  %v560_v54 = vpop.f32.mrb[3].mxu1 }
 0x287   :  { %v620_v55 = vmul.f32 0.01, %v558_v50  ;;  %v561_v56 = vadd.f32 %v2978_v46, %v560_v54 }
 0x288   :  { %v623_v57 = vmul.f32 0.01, %v569_v53  ;;  %v638_v59 = vmax.f32 %v566_v48, %v622_v52 }
 0x289   :  { %v621_v58 = vmul.f32 0.01, %v561_v56  ;;  %v636_v61 = vmax.f32 %v558_v50, %v620_v55 }
 0x28a   :  { %v639_v60 = vmax.f32 %v569_v53, %v623_v57  ;;  %v2421_v57 = vld [vmem:[#allocation10 + $0x30] sm:$0xff]  }
 0x28b   :  { %v637_v62 = vmax.f32 %v561_v56, %v621_v58  ;;  %v2167_v63 = vpop.f32.mrb[4].mxu1  ;;  %v2420_v56 = vld [vmem:[#allocation10 + $0x28] sm:$0xff]   ;;  %v2422_v58 = vld [vmem:[#allocation10 + $0x38] sm:$0xff]  }
 0x28c   :  { %v653_v0 = vpack.c.bf16 %v639_v60, %v638_v59  ;;  %v582_v1 = vadd.f32 %v2167_v63, %v2978_v46  ;;  %v573_v2 = vpop.f32.mrb[5].mxu1  ;;  %2219 = vmatprep.subr.bf16.mxu1 %v2420_v56  ;;  %v2424_v59 = vld [vmem:[#allocation11 + $0x8] sm:$0xff]   ;;  %v2425_v60 = vld [vmem:[#allocation11 + $0x10] sm:$0xff]   ;;  %v2999_v63 = vld [vmem:[%s3122_s6] ss:$0 sm:$0xff] }
 0x28d   :  { %v574_v3 = vadd.f32 %v2978_v46, %v573_v2  ;;  %v2168_v4 = vpop.f32.mrb[6].mxu1  ;;  %v652_v5 = vpack.c.bf16 %v637_v62, %v636_v61  ;;  %2220 = vmatpush3.bf16.msra.mxu1 %v2420_v56  ;;  %v2426_v61 = vld [vmem:[#allocation11 + $0x18] sm:$0xff]   ;;  %v2427_v62 = vld [vmem:[#allocation11 + $0x20] sm:$0xff]  }
 0x28e   :  { %v626_v6 = vmul.f32 0.01, %v582_v1  ;;  %v585_v7 = vadd.f32 %v2168_v4, %v2978_v46  ;;  %v576_v8 = vpop.f32.mrb[7].mxu1  ;;  %2221 = vmatprep.subr.bf16.mxu1 %v2421_v57 }
 0x28f   :  { %v624_v9 = vmul.f32 0.01, %v574_v3  ;;  %v577_v10 = vadd.f32 %v2978_v46, %v576_v8  ;;  %2193 = vmatprep.mubr.bf16.mxu0 %v652_v5 }
 0x290   :  { %v627_v11 = vmul.f32 0.01, %v585_v7  ;;  %2194 = vmatmul.mubr.bf16.vlgmr.msra.gmra.mrb[16].mxu0 %v653_v0  ;;  %v642_v13 = vmax.f32 %v582_v1, %v626_v6 }
 0x291   :  { %v625_v12 = vmul.f32 0.01, %v577_v10  ;;  %v640_v15 = vmax.f32 %v574_v3, %v624_v9  ;;  %2222 = vmatpush3.bf16.msra.mxu1 %v2421_v57 }
 0x292   :  { %v643_v14 = vmax.f32 %v585_v7, %v627_v11  ;;  %2223 = vmatprep.subr.bf16.mxu1 %v2422_v58 }
 0x293   :  { %v641_v16 = vmax.f32 %v577_v10, %v625_v12  ;;  %v2171_v17 = vpop.f32.mrb[8].mxu1 }
 0x294   :  { %v598_v18 = vadd.f32 %v2171_v17, %v2978_v46  ;;  %v589_v19 = vpop.f32.mrb[9].mxu1  ;;  %v655_v20 = vpack.c.bf16 %v643_v14, %v642_v13 }
 0x295   :  { %v590_v21 = vadd.f32 %v2978_v46, %v589_v19  ;;  %v2172_v22 = vpop.f32.mrb[10].mxu1  ;;  %v654_v23 = vpack.c.bf16 %v641_v16, %v640_v15  ;;  %2224 = vmatpush3.bf16.msra.mxu1 %v2422_v58 }
 0x296   :  { %v630_v24 = vmul.f32 0.01, %v598_v18  ;;  %v601_v25 = vadd.f32 %v2172_v22, %v2978_v46  ;;  %v592_v26 = vpop.f32.mrb[11].mxu1 }
 0x297   :  { %v628_v27 = vmul.f32 0.01, %v590_v21  ;;  %v593_v28 = vadd.f32 %v2978_v46, %v592_v26  ;;  %2197 = vmatprep.mubr.bf16.mxu0 %v654_v23 }
 0x298   :  { %v631_v30 = vmul.f32 0.01, %v601_v25  ;;  %2198 = vmatmul.mubr.bf16.gmra.mrb[20].mxu0 %v655_v20  ;;  %v646_v32 = vmax.f32 %v598_v18, %v630_v24 }
 0x299   :  { %v629_v31 = vmul.f32 0.01, %v593_v28  ;;  %v644_v34 = vmax.f32 %v590_v21, %v628_v27 }
 0x29a   :  { %v647_v33 = vmax.f32 %v601_v25, %v631_v30 }
 0x29b   :  { %v645_v35 = vmax.f32 %v593_v28, %v629_v31  ;;  %v2175_v36 = vpop.f32.mrb[12].mxu1 }
 0x29c   :  { %v614_v37 = vadd.f32 %v2175_v36, %v2978_v46  ;;  %v605_v38 = vpop.f32.mrb[13].mxu1  ;;  %v657_v39 = vpack.c.bf16 %v647_v33, %v646_v32 }
 0x29d   :  { %v606_v40 = vadd.f32 %v2978_v46, %v605_v38  ;;  %v2176_v41 = vpop.f32.mrb[14].mxu1  ;;  %v656_v29 = vpack.c.bf16 %v645_v35, %v644_v34 }
 0x29e   :  { %v634_v42 = vmul.f32 0.01, %v614_v37  ;;  %v617_v43 = vadd.f32 %v2176_v41, %v2978_v46  ;;  %v608_v44 = vpop.f32.mrb[15].mxu1 }
 0x29f   :  { %v632_v45 = vmul.f32 0.01, %v606_v40  ;;  %v609_v47 = vadd.f32 %v2978_v46, %v608_v44  ;;  %2201 = vmatprep.mubr.bf16.mxu0 %v656_v29  ;;  %v2423_v46 = vld [vmem:[#allocation11] sm:$0xff]  }
 0x2a0   :  { %v635_v48 = vmul.f32 0.01, %v617_v43  ;;  %2202 = vmatmul.mubr.bf16.gmra.mrb[24].mxu0 %v657_v39  ;;  %v650_v50 = vmax.f32 %v614_v37, %v634_v42  ;;  %2241 = vmatprep.subr.bf16.mxu0 %v2423_v46 }
 0x2a1   :  { %v633_v49 = vmul.f32 0.01, %v609_v47  ;;  %v648_v52 = vmax.f32 %v606_v40, %v632_v45  ;;  %2242 = vmatpush3.bf16.msra.mxu0 %v2423_v46 }
 0x2a2   :  { %v651_v51 = vmax.f32 %v617_v43, %v635_v48  ;;  %2243 = vmatprep.subr.bf16.mxu0 %v2424_v59 }
 0x2a3   :  { %v649_v53 = vmax.f32 %v609_v47, %v633_v49 }
 0x2a4   :  { %v659_v54 = vpack.c.bf16 %v651_v51, %v650_v50 }
 0x2a5   :  { %v658_v55 = vpack.c.bf16 %v649_v53, %v648_v52  ;;  %2244 = vmatpush3.bf16.msra.mxu0 %v2424_v59 }
 0x2a6   :  { %2245 = vmatprep.subr.bf16.mxu0 %v2425_v60 }
 0x2a7   :  { %2205 = vmatprep.mubr.bf16.mxu0 %v658_v55 }
 0x2a8   :  { %2206 = vmatmul.mubr.bf16.gmra.mrb[28].mxu0 %v659_v54 }
 0x2a9   :  { %2246 = vmatpush3.bf16.msra.mxu0 %v2425_v60 }
 0x2aa   :  { %2247 = vmatprep.subr.bf16.mxu0 %v2426_v61 }
 0x2ad   :  { %2248 = vmatpush3.bf16.msra.mxu0 %v2426_v61 }
 0x2ae   :  { %2249 = vmatprep.subr.bf16.mxu0 %v2427_v62 }
 0x2b1   :  { %2250 = vmatpush3.bf16.msra.mxu0 %v2427_v62 }
 0x363   :  { %v2195_v0 = vpop.f32.mrb[16].mxu0 }
 0x364   :  { %v774_v1 = vadd.f32 %v2195_v0, %v2999_v63  ;;  %v765_v2 = vpop.f32.mrb[17].mxu0 }
 0x365   :  { %v766_v3 = vadd.f32 %v2999_v63, %v765_v2  ;;  %v2196_v4 = vpop.f32.mrb[18].mxu0 }
 0x366   :  { %v830_v5 = vmul.f32 0.01, %v774_v1  ;;  %v777_v6 = vadd.f32 %v2196_v4, %v2999_v63  ;;  %v768_v7 = vpop.f32.mrb[19].mxu0 }
 0x367   :  { %v828_v8 = vmul.f32 0.01, %v766_v3  ;;  %v769_v9 = vadd.f32 %v2999_v63, %v768_v7 }
 0x368   :  { %v831_v10 = vmul.f32 0.01, %v777_v6  ;;  %v846_v12 = vmax.f32 %v774_v1, %v830_v5 }
 0x369   :  { %v829_v11 = vmul.f32 0.01, %v769_v9  ;;  %v844_v14 = vmax.f32 %v766_v3, %v828_v8 }
 0x36a   :  { %v847_v13 = vmax.f32 %v777_v6, %v831_v10  ;;  %v2429_v10 = vld [vmem:[#allocation11 + $0x30] sm:$0xff]  }
 0x36b   :  { %v845_v15 = vmax.f32 %v769_v9, %v829_v11  ;;  %v2199_v16 = vpop.f32.mrb[20].mxu0  ;;  %v2428_v9 = vld [vmem:[#allocation11 + $0x28] sm:$0xff]   ;;  %v2430_v11 = vld [vmem:[#allocation11 + $0x38] sm:$0xff]  }
 0x36c   :  { %v861_v17 = vpack.c.bf16 %v847_v13, %v846_v12  ;;  %v790_v18 = vadd.f32 %v2199_v16, %v2999_v63  ;;  %v781_v19 = vpop.f32.mrb[21].mxu0  ;;  %2251 = vmatprep.subr.bf16.mxu0 %v2428_v9  ;;  %v2432_v12 = vld [vmem:[#allocation13 + $0x8] sm:$0xff]   ;;  %v2433_v13 = vld [vmem:[#allocation13 + $0x10] sm:$0xff]   ;;  %v3020_v16 = vld [vmem:[%s3124_s8] ss:$0 sm:$0xff] }
 0x36d   :  { %v782_v20 = vadd.f32 %v2999_v63, %v781_v19  ;;  %v2200_v21 = vpop.f32.mrb[22].mxu0  ;;  %v860_v22 = vpack.c.bf16 %v845_v15, %v844_v14  ;;  %2252 = vmatpush3.bf16.msra.mxu0 %v2428_v9  ;;  %v2434_v14 = vld [vmem:[#allocation13 + $0x18] sm:$0xff]   ;;  %v2435_v15 = vld [vmem:[#allocation13 + $0x20] sm:$0xff]  }
 0x36e   :  { %v834_v23 = vmul.f32 0.01, %v790_v18  ;;  %v793_v24 = vadd.f32 %v2200_v21, %v2999_v63  ;;  %v784_v25 = vpop.f32.mrb[23].mxu0  ;;  %2253 = vmatprep.subr.bf16.mxu0 %v2429_v10 }
 0x36f   :  { %v832_v26 = vmul.f32 0.01, %v782_v20  ;;  %v785_v27 = vadd.f32 %v2999_v63, %v784_v25  ;;  %2225 = vmatprep.mubr.bf16.mxu1 %v860_v22 }
 0x370   :  { %v835_v28 = vmul.f32 0.01, %v793_v24  ;;  %2226 = vmatmul.mubr.bf16.vlgmr.msra.gmra.mrb[16].mxu1 %v861_v17  ;;  %v850_v31 = vmax.f32 %v790_v18, %v834_v23 }
 0x371   :  { %v833_v30 = vmul.f32 0.01, %v785_v27  ;;  %v848_v33 = vmax.f32 %v782_v20, %v832_v26  ;;  %2254 = vmatpush3.bf16.msra.mxu0 %v2429_v10 }
 0x372   :  { %v851_v32 = vmax.f32 %v793_v24, %v835_v28  ;;  %2255 = vmatprep.subr.bf16.mxu0 %v2430_v11 }
 0x373   :  { %v849_v34 = vmax.f32 %v785_v27, %v833_v30  ;;  %v2203_v35 = vpop.f32.mrb[24].mxu0 }
 0x374   :  { %v806_v36 = vadd.f32 %v2203_v35, %v2999_v63  ;;  %v797_v37 = vpop.f32.mrb[25].mxu0  ;;  %v863_v38 = vpack.c.bf16 %v851_v32, %v850_v31 }
 0x375   :  { %v798_v39 = vadd.f32 %v2999_v63, %v797_v37  ;;  %v2204_v40 = vpop.f32.mrb[26].mxu0  ;;  %v862_v41 = vpack.c.bf16 %v849_v34, %v848_v33  ;;  %2256 = vmatpush3.bf16.msra.mxu0 %v2430_v11 }
 0x376   :  { %v838_v29 = vmul.f32 0.01, %v806_v36  ;;  %v809_v42 = vadd.f32 %v2204_v40, %v2999_v63  ;;  %v800_v43 = vpop.f32.mrb[27].mxu0 }
 0x377   :  { %v836_v44 = vmul.f32 0.01, %v798_v39  ;;  %v801_v45 = vadd.f32 %v2999_v63, %v800_v43  ;;  %2229 = vmatprep.mubr.bf16.mxu1 %v862_v41 }
 0x378   :  { %v839_v47 = vmul.f32 0.01, %v809_v42  ;;  %2230 = vmatmul.mubr.bf16.gmra.mrb[20].mxu1 %v863_v38  ;;  %v854_v49 = vmax.f32 %v806_v36, %v838_v29 }
 0x379   :  { %v837_v48 = vmul.f32 0.01, %v801_v45  ;;  %v852_v51 = vmax.f32 %v798_v39, %v836_v44 }
 0x37a   :  { %v855_v50 = vmax.f32 %v809_v42, %v839_v47 }
 0x37b   :  { %v853_v52 = vmax.f32 %v801_v45, %v837_v48  ;;  %v2207_v53 = vpop.f32.mrb[28].mxu0 }
 0x37c   :  { %v822_v54 = vadd.f32 %v2207_v53, %v2999_v63  ;;  %v813_v55 = vpop.f32.mrb[29].mxu0  ;;  %v865_v56 = vpack.c.bf16 %v855_v50, %v854_v49 }
 0x37d   :  { %v814_v57 = vadd.f32 %v2999_v63, %v813_v55  ;;  %v2208_v58 = vpop.f32.mrb[30].mxu0  ;;  %v864_v46 = vpack.c.bf16 %v853_v52, %v852_v51 }
 0x37e   :  { %v842_v59 = vmul.f32 0.01, %v822_v54  ;;  %v825_v60 = vadd.f32 %v2208_v58, %v2999_v63  ;;  %v816_v61 = vpop.f32.mrb[31].mxu0 }
 0x37f   :  { %v840_v62 = vmul.f32 0.01, %v814_v57  ;;  %v817_v0 = vadd.f32 %v2999_v63, %v816_v61  ;;  %2233 = vmatprep.mubr.bf16.mxu1 %v864_v46  ;;  %v2431_v63 = vld [vmem:[#allocation13] sm:$0xff]  }
 0x380   :  { %v843_v1 = vmul.f32 0.01, %v825_v60  ;;  %2234 = vmatmul.mubr.bf16.gmra.mrb[24].mxu1 %v865_v56  ;;  %v858_v3 = vmax.f32 %v822_v54, %v842_v59  ;;  %2273 = vmatprep.subr.bf16.mxu1 %v2431_v63 }
 0x381   :  { %v841_v2 = vmul.f32 0.01, %v817_v0  ;;  %v856_v5 = vmax.f32 %v814_v57, %v840_v62  ;;  %2274 = vmatpush3.bf16.msra.mxu1 %v2431_v63 }
 0x382   :  { %v859_v4 = vmax.f32 %v825_v60, %v843_v1  ;;  %2275 = vmatprep.subr.bf16.mxu1 %v2432_v12 }
 0x383   :  { %v857_v6 = vmax.f32 %v817_v0, %v841_v2 }
 0x384   :  { %v867_v7 = vpack.c.bf16 %v859_v4, %v858_v3 }
 0x385   :  { %v866_v8 = vpack.c.bf16 %v857_v6, %v856_v5  ;;  %2276 = vmatpush3.bf16.msra.mxu1 %v2432_v12 }
 0x386   :  { %2277 = vmatprep.subr.bf16.mxu1 %v2433_v13 }
 0x387   :  { %2237 = vmatprep.mubr.bf16.mxu1 %v866_v8 }
 0x388   :  { %2238 = vmatmul.mubr.bf16.gmra.mrb[28].mxu1 %v867_v7 }
 0x389   :  { %2278 = vmatpush3.bf16.msra.mxu1 %v2433_v13 }
 0x38a   :  { %2279 = vmatprep.subr.bf16.mxu1 %v2434_v14 }
 0x38d   :  { %2280 = vmatpush3.bf16.msra.mxu1 %v2434_v14 }
 0x38e   :  { %2281 = vmatprep.subr.bf16.mxu1 %v2435_v15 }
 0x391   :  { %2282 = vmatpush3.bf16.msra.mxu1 %v2435_v15 }
 0x443   :  { %v2227_v17 = vpop.f32.mrb[16].mxu1 }
 0x444   :  { %v982_v18 = vadd.f32 %v2227_v17, %v3020_v16  ;;  %v973_v19 = vpop.f32.mrb[17].mxu1 }
 0x445   :  { %v974_v20 = vadd.f32 %v3020_v16, %v973_v19  ;;  %v2228_v21 = vpop.f32.mrb[18].mxu1 }
 0x446   :  { %v1038_v22 = vmul.f32 0.01, %v982_v18  ;;  %v985_v23 = vadd.f32 %v2228_v21, %v3020_v16  ;;  %v976_v24 = vpop.f32.mrb[19].mxu1 }
 0x447   :  { %v1036_v25 = vmul.f32 0.01, %v974_v20  ;;  %v977_v26 = vadd.f32 %v3020_v16, %v976_v24 }
 0x448   :  { %v1039_v27 = vmul.f32 0.01, %v985_v23  ;;  %v1054_v30 = vmax.f32 %v982_v18, %v1038_v22 }
 0x449   :  { %v1037_v28 = vmul.f32 0.01, %v977_v26  ;;  %v1052_v32 = vmax.f32 %v974_v20, %v1036_v25 }
 0x44a   :  { %v1055_v31 = vmax.f32 %v985_v23, %v1039_v27  ;;  %v2437_v27 = vld [vmem:[#allocation13 + $0x30] sm:$0xff]  }
 0x44b   :  { %v1053_v33 = vmax.f32 %v977_v26, %v1037_v28  ;;  %v2231_v34 = vpop.f32.mrb[20].mxu1  ;;  %v2436_v26 = vld [vmem:[#allocation13 + $0x28] sm:$0xff]   ;;  %v2438_v28 = vld [vmem:[#allocation13 + $0x38] sm:$0xff]  }
 0x44c   :  { %v1069_v35 = vpack.c.bf16 %v1055_v31, %v1054_v30  ;;  %v998_v36 = vadd.f32 %v2231_v34, %v3020_v16  ;;  %v989_v37 = vpop.f32.mrb[21].mxu1  ;;  %2283 = vmatprep.subr.bf16.mxu1 %v2436_v26  ;;  %v2440_v30 = vld [vmem:[#allocation14 + $0x8] sm:$0xff]   ;;  %v2441_v31 = vld [vmem:[#allocation14 + $0x10] sm:$0xff]   ;;  %v3041_v34 = vld [vmem:[%s3126_s10] ss:$0 sm:$0xff] }
 0x44d   :  { %v990_v38 = vadd.f32 %v3020_v16, %v989_v37  ;;  %v2232_v39 = vpop.f32.mrb[22].mxu1  ;;  %v1068_v40 = vpack.c.bf16 %v1053_v33, %v1052_v32  ;;  %2284 = vmatpush3.bf16.msra.mxu1 %v2436_v26  ;;  %v2442_v32 = vld [vmem:[#allocation14 + $0x18] sm:$0xff]   ;;  %v2443_v33 = vld [vmem:[#allocation14 + $0x20] sm:$0xff]  }
 0x44e   :  { %v1042_v41 = vmul.f32 0.01, %v998_v36  ;;  %v1001_v29 = vadd.f32 %v2232_v39, %v3020_v16  ;;  %v992_v42 = vpop.f32.mrb[23].mxu1  ;;  %2285 = vmatprep.subr.bf16.mxu1 %v2437_v27 }
 0x44f   :  { %v1040_v43 = vmul.f32 0.01, %v990_v38  ;;  %v993_v44 = vadd.f32 %v3020_v16, %v992_v42  ;;  %2257 = vmatprep.mubr.bf16.mxu0 %v1068_v40 }
 0x450   :  { %v1043_v45 = vmul.f32 0.01, %v1001_v29  ;;  %2258 = vmatmul.mubr.bf16.vlgmr.msra.gmra.mrb[32].mxu0 %v1069_v35  ;;  %v1058_v48 = vmax.f32 %v998_v36, %v1042_v41 }
 0x451   :  { %v1041_v47 = vmul.f32 0.01, %v993_v44  ;;  %v1056_v50 = vmax.f32 %v990_v38, %v1040_v43  ;;  %2286 = vmatpush3.bf16.msra.mxu1 %v2437_v27 }
 0x452   :  { %v1059_v49 = vmax.f32 %v1001_v29, %v1043_v45  ;;  %2287 = vmatprep.subr.bf16.mxu1 %v2438_v28 }
 0x453   :  { %v1057_v51 = vmax.f32 %v993_v44, %v1041_v47  ;;  %v2235_v52 = vpop.f32.mrb[24].mxu1 }
 0x454   :  { %v1014_v53 = vadd.f32 %v2235_v52, %v3020_v16  ;;  %v1005_v54 = vpop.f32.mrb[25].mxu1  ;;  %v1071_v55 = vpack.c.bf16 %v1059_v49, %v1058_v48 }
 0x455   :  { %v1006_v56 = vadd.f32 %v3020_v16, %v1005_v54  ;;  %v2236_v57 = vpop.f32.mrb[26].mxu1  ;;  %v1070_v58 = vpack.c.bf16 %v1057_v51, %v1056_v50  ;;  %2288 = vmatpush3.bf16.msra.mxu1 %v2438_v28 }
 0x456   :  { %v1046_v46 = vmul.f32 0.01, %v1014_v53  ;;  %v1017_v59 = vadd.f32 %v2236_v57, %v3020_v16  ;;  %v1008_v60 = vpop.f32.mrb[27].mxu1 }
 0x457   :  { %v1044_v61 = vmul.f32 0.01, %v1006_v56  ;;  %v1009_v62 = vadd.f32 %v3020_v16, %v1008_v60  ;;  %2261 = vmatprep.mubr.bf16.mxu0 %v1070_v58 }
 0x458   :  { %v1047_v0 = vmul.f32 0.01, %v1017_v59  ;;  %2262 = vmatmul.mubr.bf16.gmra.mrb[36].mxu0 %v1071_v55  ;;  %v1062_v2 = vmax.f32 %v1014_v53, %v1046_v46 }
 0x459   :  { %v1045_v1 = vmul.f32 0.01, %v1009_v62  ;;  %v1060_v4 = vmax.f32 %v1006_v56, %v1044_v61 }
 0x45a   :  { %v1063_v3 = vmax.f32 %v1017_v59, %v1047_v0 }
 0x45b   :  { %v1061_v5 = vmax.f32 %v1009_v62, %v1045_v1  ;;  %v2239_v6 = vpop.f32.mrb[28].mxu1 }
 0x45c   :  { %v1030_v7 = vadd.f32 %v2239_v6, %v3020_v16  ;;  %v1021_v8 = vpop.f32.mrb[29].mxu1  ;;  %v1073_v9 = vpack.c.bf16 %v1063_v3, %v1062_v2 }
 0x45d   :  { %v1022_v10 = vadd.f32 %v3020_v16, %v1021_v8  ;;  %v2240_v11 = vpop.f32.mrb[30].mxu1  ;;  %v1072_v63 = vpack.c.bf16 %v1061_v5, %v1060_v4 }
 0x45e   :  { %v1050_v12 = vmul.f32 0.01, %v1030_v7  ;;  %v1033_v13 = vadd.f32 %v2240_v11, %v3020_v16  ;;  %v1024_v14 = vpop.f32.mrb[31].mxu1 }
 0x45f   :  { %v1048_v15 = vmul.f32 0.01, %v1022_v10  ;;  %v1025_v17 = vadd.f32 %v3020_v16, %v1024_v14  ;;  %2265 = vmatprep.mubr.bf16.mxu0 %v1072_v63  ;;  %v2439_v16 = vld [vmem:[#allocation14] sm:$0xff]  }
 0x460   :  { %v1051_v18 = vmul.f32 0.01, %v1033_v13  ;;  %2266 = vmatmul.mubr.bf16.gmra.mrb[40].mxu0 %v1073_v9  ;;  %v1066_v20 = vmax.f32 %v1030_v7, %v1050_v12  ;;  %2305 = vmatprep.subr.bf16.mxu0 %v2439_v16 }
 0x461   :  { %v1049_v19 = vmul.f32 0.01, %v1025_v17  ;;  %v1064_v22 = vmax.f32 %v1022_v10, %v1048_v15  ;;  %2306 = vmatpush3.bf16.msra.mxu0 %v2439_v16 }
 0x462   :  { %v1067_v21 = vmax.f32 %v1033_v13, %v1051_v18  ;;  %2307 = vmatprep.subr.bf16.mxu0 %v2440_v30 }
 0x463   :  { %v1065_v23 = vmax.f32 %v1025_v17, %v1049_v19 }
 0x464   :  { %v1075_v24 = vpack.c.bf16 %v1067_v21, %v1066_v20 }
 0x465   :  { %v1074_v25 = vpack.c.bf16 %v1065_v23, %v1064_v22  ;;  %2308 = vmatpush3.bf16.msra.mxu0 %v2440_v30 }
 0x466   :  { %2309 = vmatprep.subr.bf16.mxu0 %v2441_v31 }
 0x467   :  { %2269 = vmatprep.mubr.bf16.mxu0 %v1074_v25 }
 0x468   :  { %2270 = vmatmul.mubr.bf16.gmra.mrb[44].mxu0 %v1075_v24 }
 0x469   :  { %2310 = vmatpush3.bf16.msra.mxu0 %v2441_v31 }
 0x46a   :  { %2311 = vmatprep.subr.bf16.mxu0 %v2442_v32 }
 0x46d   :  { %2312 = vmatpush3.bf16.msra.mxu0 %v2442_v32 }
 0x46e   :  { %2313 = vmatprep.subr.bf16.mxu0 %v2443_v33 }
 0x471   :  { %2314 = vmatpush3.bf16.msra.mxu0 %v2443_v33 }
 0x523   :  { %v2259_v35 = vpop.f32.mrb[32].mxu0 }
 0x524   :  { %v1190_v36 = vadd.f32 %v2259_v35, %v3041_v34  ;;  %v1181_v37 = vpop.f32.mrb[33].mxu0 }
 0x525   :  { %v1182_v38 = vadd.f32 %v3041_v34, %v1181_v37  ;;  %v2260_v39 = vpop.f32.mrb[34].mxu0 }
 0x526   :  { %v1246_v40 = vmul.f32 0.01, %v1190_v36  ;;  %v1193_v41 = vadd.f32 %v2260_v39, %v3041_v34  ;;  %v1184_v29 = vpop.f32.mrb[35].mxu0 }
 0x527   :  { %v1244_v42 = vmul.f32 0.01, %v1182_v38  ;;  %v1185_v43 = vadd.f32 %v3041_v34, %v1184_v29 }
 0x528   :  { %v1247_v44 = vmul.f32 0.01, %v1193_v41  ;;  %v1262_v47 = vmax.f32 %v1190_v36, %v1246_v40 }
 0x529   :  { %v1245_v45 = vmul.f32 0.01, %v1185_v43  ;;  %v1260_v49 = vmax.f32 %v1182_v38, %v1244_v42 }
 0x52a   :  { %v1263_v48 = vmax.f32 %v1193_v41, %v1247_v44  ;;  %v2445_v44 = vld [vmem:[#allocation14 + $0x30] sm:$0xff]  }
 0x52b   :  { %v1261_v50 = vmax.f32 %v1185_v43, %v1245_v45  ;;  %v2263_v51 = vpop.f32.mrb[36].mxu0  ;;  %v2444_v43 = vld [vmem:[#allocation14 + $0x28] sm:$0xff]   ;;  %v2446_v45 = vld [vmem:[#allocation14 + $0x38] sm:$0xff]  }
 0x52c   :  { %v1277_v52 = vpack.c.bf16 %v1263_v48, %v1262_v47  ;;  %v1206_v53 = vadd.f32 %v2263_v51, %v3041_v34  ;;  %v1197_v54 = vpop.f32.mrb[37].mxu0  ;;  %2315 = vmatprep.subr.bf16.mxu0 %v2444_v43  ;;  %v2448_v47 = vld [vmem:[#allocation16 + $0x8] sm:$0xff]   ;;  %v2449_v48 = vld [vmem:[#allocation16 + $0x10] sm:$0xff]   ;;  %v3062_v51 = vld [vmem:[%s3128_s12] ss:$0 sm:$0xff] }
 0x52d   :  { %v1198_v55 = vadd.f32 %v3041_v34, %v1197_v54  ;;  %v2264_v56 = vpop.f32.mrb[38].mxu0  ;;  %v1276_v57 = vpack.c.bf16 %v1261_v50, %v1260_v49  ;;  %2316 = vmatpush3.bf16.msra.mxu0 %v2444_v43  ;;  %v2450_v49 = vld [vmem:[#allocation16 + $0x18] sm:$0xff]   ;;  %v2451_v50 = vld [vmem:[#allocation16 + $0x20] sm:$0xff]  }
 0x52e   :  { %v1250_v58 = vmul.f32 0.01, %v1206_v53  ;;  %v1209_v46 = vadd.f32 %v2264_v56, %v3041_v34  ;;  %v1200_v59 = vpop.f32.mrb[39].mxu0  ;;  %2317 = vmatprep.subr.bf16.mxu0 %v2445_v44 }
 0x52f   :  { %v1248_v60 = vmul.f32 0.01, %v1198_v55  ;;  %v1201_v61 = vadd.f32 %v3041_v34, %v1200_v59  ;;  %2289 = vmatprep.mubr.bf16.mxu1 %v1276_v57 }
 0x530   :  { %v1251_v62 = vmul.f32 0.01, %v1209_v46  ;;  %2290 = vmatmul.mubr.bf16.vlgmr.msra.gmra.mrb[32].mxu1 %v1277_v52  ;;  %v1266_v1 = vmax.f32 %v1206_v53, %v1250_v58 }
 0x531   :  { %v1249_v0 = vmul.f32 0.01, %v1201_v61  ;;  %v1264_v3 = vmax.f32 %v1198_v55, %v1248_v60  ;;  %2318 = vmatpush3.bf16.msra.mxu0 %v2445_v44 }
 0x532   :  { %v1267_v2 = vmax.f32 %v1209_v46, %v1251_v62  ;;  %2319 = vmatprep.subr.bf16.mxu0 %v2446_v45 }
 0x533   :  { %v1265_v4 = vmax.f32 %v1201_v61, %v1249_v0  ;;  %v2267_v5 = vpop.f32.mrb[40].mxu0 }
 0x534   :  { %v1222_v6 = vadd.f32 %v2267_v5, %v3041_v34  ;;  %v1213_v7 = vpop.f32.mrb[41].mxu0  ;;  %v1279_v8 = vpack.c.bf16 %v1267_v2, %v1266_v1 }
 0x535   :  { %v1214_v9 = vadd.f32 %v3041_v34, %v1213_v7  ;;  %v2268_v10 = vpop.f32.mrb[42].mxu0  ;;  %v1278_v11 = vpack.c.bf16 %v1265_v4, %v1264_v3  ;;  %2320 = vmatpush3.bf16.msra.mxu0 %v2446_v45 }
 0x536   :  { %v1254_v63 = vmul.f32 0.01, %v1222_v6  ;;  %v1225_v12 = vadd.f32 %v2268_v10, %v3041_v34  ;;  %v1216_v13 = vpop.f32.mrb[43].mxu0 }
 0x537   :  { %v1252_v14 = vmul.f32 0.01, %v1214_v9  ;;  %v1217_v15 = vadd.f32 %v3041_v34, %v1216_v13  ;;  %2293 = vmatprep.mubr.bf16.mxu1 %v1278_v11 }
 0x538   :  { %v1255_v17 = vmul.f32 0.01, %v1225_v12  ;;  %2294 = vmatmul.mubr.bf16.gmra.mrb[36].mxu1 %v1279_v8  ;;  %v1270_v19 = vmax.f32 %v1222_v6, %v1254_v63 }
 0x539   :  { %v1253_v18 = vmul.f32 0.01, %v1217_v15  ;;  %v1268_v21 = vmax.f32 %v1214_v9, %v1252_v14 }
 0x53a   :  { %v1271_v20 = vmax.f32 %v1225_v12, %v1255_v17 }
 0x53b   :  { %v1269_v22 = vmax.f32 %v1217_v15, %v1253_v18  ;;  %v2271_v23 = vpop.f32.mrb[44].mxu0 }
 0x53c   :  { %v1238_v24 = vadd.f32 %v2271_v23, %v3041_v34  ;;  %v1229_v25 = vpop.f32.mrb[45].mxu0  ;;  %v1281_v26 = vpack.c.bf16 %v1271_v20, %v1270_v19 }
 0x53d   :  { %v1230_v27 = vadd.f32 %v3041_v34, %v1229_v25  ;;  %v2272_v28 = vpop.f32.mrb[46].mxu0  ;;  %v1280_v16 = vpack.c.bf16 %v1269_v22, %v1268_v21 }
 0x53e   :  { %v1258_v30 = vmul.f32 0.01, %v1238_v24  ;;  %v1241_v31 = vadd.f32 %v2272_v28, %v3041_v34  ;;  %v1232_v32 = vpop.f32.mrb[47].mxu0 }
 0x53f   :  { %v1256_v33 = vmul.f32 0.01, %v1230_v27  ;;  %v1233_v35 = vadd.f32 %v3041_v34, %v1232_v32  ;;  %2297 = vmatprep.mubr.bf16.mxu1 %v1280_v16  ;;  %v2447_v34 = vld [vmem:[#allocation16] sm:$0xff]  }
 0x540   :  { %v1259_v36 = vmul.f32 0.01, %v1241_v31  ;;  %2298 = vmatmul.mubr.bf16.gmra.mrb[40].mxu1 %v1281_v26  ;;  %v1274_v38 = vmax.f32 %v1238_v24, %v1258_v30  ;;  %2337 = vmatprep.subr.bf16.mxu1 %v2447_v34 }
 0x541   :  { %v1257_v37 = vmul.f32 0.01, %v1233_v35  ;;  %v1272_v40 = vmax.f32 %v1230_v27, %v1256_v33  ;;  %2338 = vmatpush3.bf16.msra.mxu1 %v2447_v34 }
 0x542   :  { %v1275_v39 = vmax.f32 %v1241_v31, %v1259_v36  ;;  %2339 = vmatprep.subr.bf16.mxu1 %v2448_v47 }
 0x543   :  { %v1273_v41 = vmax.f32 %v1233_v35, %v1257_v37 }
 0x544   :  { %v1283_v29 = vpack.c.bf16 %v1275_v39, %v1274_v38 }
 0x545   :  { %v1282_v42 = vpack.c.bf16 %v1273_v41, %v1272_v40  ;;  %2340 = vmatpush3.bf16.msra.mxu1 %v2448_v47 }
 0x546   :  { %2341 = vmatprep.subr.bf16.mxu1 %v2449_v48 }
 0x547   :  { %2301 = vmatprep.mubr.bf16.mxu1 %v1282_v42 }
 0x548   :  { %2302 = vmatmul.mubr.bf16.gmra.mrb[44].mxu1 %v1283_v29 }
 0x549   :  { %2342 = vmatpush3.bf16.msra.mxu1 %v2449_v48 }
 0x54a   :  { %2343 = vmatprep.subr.bf16.mxu1 %v2450_v49 }
 0x54d   :  { %2344 = vmatpush3.bf16.msra.mxu1 %v2450_v49 }
 0x54e   :  { %2345 = vmatprep.subr.bf16.mxu1 %v2451_v50 }
 0x551   :  { %2346 = vmatpush3.bf16.msra.mxu1 %v2451_v50 }
 0x603   :  { %v2291_v52 = vpop.f32.mrb[32].mxu1 }
 0x604   :  { %v1398_v53 = vadd.f32 %v2291_v52, %v3062_v51  ;;  %v1389_v54 = vpop.f32.mrb[33].mxu1 }
 0x605   :  { %v1390_v55 = vadd.f32 %v3062_v51, %v1389_v54  ;;  %v2292_v56 = vpop.f32.mrb[34].mxu1 }
 0x606   :  { %v1454_v57 = vmul.f32 0.01, %v1398_v53  ;;  %v1401_v58 = vadd.f32 %v2292_v56, %v3062_v51  ;;  %v1392_v46 = vpop.f32.mrb[35].mxu1 }
 0x607   :  { %v1452_v59 = vmul.f32 0.01, %v1390_v55  ;;  %v1393_v60 = vadd.f32 %v3062_v51, %v1392_v46 }
 0x608   :  { %v1455_v61 = vmul.f32 0.01, %v1401_v58  ;;  %v1470_v0 = vmax.f32 %v1398_v53, %v1454_v57 }
 0x609   :  { %v1453_v62 = vmul.f32 0.01, %v1393_v60  ;;  %v1468_v2 = vmax.f32 %v1390_v55, %v1452_v59 }
 0x60a   :  { %v1471_v1 = vmax.f32 %v1401_v58, %v1455_v61  ;;  %v2453_v61 = vld [vmem:[#allocation16 + $0x30] sm:$0xff]  }
 0x60b   :  { %v1469_v3 = vmax.f32 %v1393_v60, %v1453_v62  ;;  %v2295_v4 = vpop.f32.mrb[36].mxu1  ;;  %v2452_v60 = vld [vmem:[#allocation16 + $0x28] sm:$0xff]   ;;  %v2454_v62 = vld [vmem:[#allocation16 + $0x38] sm:$0xff]  }
 0x60c   :  { %v1485_v5 = vpack.c.bf16 %v1471_v1, %v1470_v0  ;;  %v1414_v6 = vadd.f32 %v2295_v4, %v3062_v51  ;;  %v1405_v7 = vpop.f32.mrb[37].mxu1  ;;  %2347 = vmatprep.subr.bf16.mxu1 %v2452_v60 }
 0x60d   :  { %v1406_v8 = vadd.f32 %v3062_v51, %v1405_v7  ;;  %v2296_v9 = vpop.f32.mrb[38].mxu1  ;;  %v1484_v10 = vpack.c.bf16 %v1469_v3, %v1468_v2  ;;  %2348 = vmatpush3.bf16.msra.mxu1 %v2452_v60 }
 0x60e   :  { %v1458_v11 = vmul.f32 0.01, %v1414_v6  ;;  %v1417_v63 = vadd.f32 %v2296_v9, %v3062_v51  ;;  %v1408_v12 = vpop.f32.mrb[39].mxu1  ;;  %2349 = vmatprep.subr.bf16.mxu1 %v2453_v61 }
 0x60f   :  { %v1456_v13 = vmul.f32 0.01, %v1406_v8  ;;  %v1409_v14 = vadd.f32 %v3062_v51, %v1408_v12  ;;  %2321 = vmatprep.mubr.bf16.mxu0 %v1484_v10 }
 0x610   :  { %v1459_v15 = vmul.f32 0.01, %v1417_v63  ;;  %2322 = vmatmul.mubr.bf16.vlgmr.msra.gmra.mrb[48].mxu0 %v1485_v5  ;;  %v1474_v18 = vmax.f32 %v1414_v6, %v1458_v11 }
 0x611   :  { %v1457_v17 = vmul.f32 0.01, %v1409_v14  ;;  %v1472_v20 = vmax.f32 %v1406_v8, %v1456_v13  ;;  %2350 = vmatpush3.bf16.msra.mxu1 %v2453_v61 }
 0x612   :  { %v1475_v19 = vmax.f32 %v1417_v63, %v1459_v15  ;;  %2351 = vmatprep.subr.bf16.mxu1 %v2454_v62 }
 0x613   :  { %v1473_v21 = vmax.f32 %v1409_v14, %v1457_v17  ;;  %v2299_v22 = vpop.f32.mrb[40].mxu1 }
 0x614   :  { %v1430_v23 = vadd.f32 %v2299_v22, %v3062_v51  ;;  %v1421_v24 = vpop.f32.mrb[41].mxu1  ;;  %v1487_v25 = vpack.c.bf16 %v1475_v19, %v1474_v18 }
 0x615   :  { %v1422_v26 = vadd.f32 %v3062_v51, %v1421_v24  ;;  %v2300_v27 = vpop.f32.mrb[42].mxu1  ;;  %v1486_v28 = vpack.c.bf16 %v1473_v21, %v1472_v20  ;;  %2352 = vmatpush3.bf16.msra.mxu1 %v2454_v62 }
 0x616   :  { %v1462_v16 = vmul.f32 0.01, %v1430_v23  ;;  %v1433_v30 = vadd.f32 %v2300_v27, %v3062_v51  ;;  %v1424_v31 = vpop.f32.mrb[43].mxu1 }
 0x617   :  { %v1460_v32 = vmul.f32 0.01, %v1422_v26  ;;  %v1425_v33 = vadd.f32 %v3062_v51, %v1424_v31  ;;  %2325 = vmatprep.mubr.bf16.mxu0 %v1486_v28 }
 0x618   :  { %v1463_v35 = vmul.f32 0.01, %v1433_v30  ;;  %2326 = vmatmul.mubr.bf16.gmra.mrb[52].mxu0 %v1487_v25  ;;  %v1478_v37 = vmax.f32 %v1430_v23, %v1462_v16 }
 0x619   :  { %v1461_v36 = vmul.f32 0.01, %v1425_v33  ;;  %v1476_v39 = vmax.f32 %v1422_v26, %v1460_v32 }
 0x61a   :  { %v1479_v38 = vmax.f32 %v1433_v30, %v1463_v35 }
 0x61b   :  { %v1477_v40 = vmax.f32 %v1425_v33, %v1461_v36  ;;  %v2303_v41 = vpop.f32.mrb[44].mxu1 }
 0x61c   :  { %v1446_v29 = vadd.f32 %v2303_v41, %v3062_v51  ;;  %v1437_v42 = vpop.f32.mrb[45].mxu1  ;;  %v1489_v43 = vpack.c.bf16 %v1479_v38, %v1478_v37 }
 0x61d   :  { %v1438_v44 = vadd.f32 %v3062_v51, %v1437_v42  ;;  %v2304_v45 = vpop.f32.mrb[46].mxu1  ;;  %v1488_v34 = vpack.c.bf16 %v1477_v40, %v1476_v39 }
 0x61e   :  { %v1466_v47 = vmul.f32 0.01, %v1446_v29  ;;  %v1449_v48 = vadd.f32 %v2304_v45, %v3062_v51  ;;  %v1440_v49 = vpop.f32.mrb[47].mxu1 }
 0x61f   :  { %v1464_v50 = vmul.f32 0.01, %v1438_v44  ;;  %v1441_v52 = vadd.f32 %v3062_v51, %v1440_v49  ;;  %2329 = vmatprep.mubr.bf16.mxu0 %v1488_v34  ;;  %v3083_v51 = vld [vmem:[%s3130_s14] ss:$0 sm:$0xff] }
 0x620   :  { %v1467_v53 = vmul.f32 0.01, %v1449_v48  ;;  %2330 = vmatmul.mubr.bf16.gmra.mrb[56].mxu0 %v1489_v43  ;;  %v1482_v55 = vmax.f32 %v1446_v29, %v1466_v47 }
 0x621   :  { %v1465_v54 = vmul.f32 0.01, %v1441_v52  ;;  %v1480_v57 = vmax.f32 %v1438_v44, %v1464_v50 }
 0x622   :  { %v1483_v56 = vmax.f32 %v1449_v48, %v1467_v53 }
 0x623   :  { %v1481_v58 = vmax.f32 %v1441_v52, %v1465_v54 }
 0x624   :  { %v1491_v46 = vpack.c.bf16 %v1483_v56, %v1482_v55 }
 0x625   :  { %v1490_v59 = vpack.c.bf16 %v1481_v58, %v1480_v57 }
 0x627   :  { %2333 = vmatprep.mubr.bf16.mxu0 %v1490_v59 }
 0x628   :  { %2334 = vmatmul.mubr.bf16.gmra.mrb[60].mxu0 %v1491_v46 }
 0x6e3   :  { %v2323_v0 = vpop.f32.mrb[48].mxu0 }
 0x6e4   :  { %v1606_v1 = vadd.f32 %v2323_v0, %v3083_v51  ;;  %v1597_v2 = vpop.f32.mrb[49].mxu0 }
 0x6e5   :  { %v1598_v3 = vadd.f32 %v3083_v51, %v1597_v2  ;;  %v2324_v4 = vpop.f32.mrb[50].mxu0 }
 0x6e6   :  { %v1662_v5 = vmul.f32 0.01, %v1606_v1  ;;  %v1609_v6 = vadd.f32 %v2324_v4, %v3083_v51  ;;  %v1600_v7 = vpop.f32.mrb[51].mxu0 }
 0x6e7   :  { %v1660_v8 = vmul.f32 0.01, %v1598_v3  ;;  %v1601_v9 = vadd.f32 %v3083_v51, %v1600_v7 }
 0x6e8   :  { %v1663_v10 = vmul.f32 0.01, %v1609_v6  ;;  %v1678_v63 = vmax.f32 %v1606_v1, %v1662_v5 }
 0x6e9   :  { %v1661_v11 = vmul.f32 0.01, %v1601_v9  ;;  %v1676_v13 = vmax.f32 %v1598_v3, %v1660_v8 }
 0x6ea   :  { %v1679_v12 = vmax.f32 %v1609_v6, %v1663_v10 }
 0x6eb   :  { %v1677_v14 = vmax.f32 %v1601_v9, %v1661_v11  ;;  %v2327_v15 = vpop.f32.mrb[52].mxu0  ;;  %v1976_v9 = vld [vmem:[%s3132_s16] ss:$0 sm:$0xff]  ;;  %s2698_s16 = smov [#allocation17]  }
 0x6ec   :  { %v1693_v17 = vpack.c.bf16 %v1679_v12, %v1678_v63  ;;  %v1622_v18 = vadd.f32 %v2327_v15, %v3083_v51  ;;  %v1613_v19 = vpop.f32.mrb[53].mxu0  ;;  %s1889_s7 = sshll.u32 %s2698_s16, 4  ;;  %s1890_s7 = int_to_ptr.vmem [resolvable:$true] %s1889_s7 }
 0x6ed   :  { %v1614_v20 = vadd.f32 %v3083_v51, %v1613_v19  ;;  %v2328_v21 = vpop.f32.mrb[54].mxu0  ;;  %v1692_v22 = vpack.c.bf16 %v1677_v14, %v1676_v13  ;;  %s2653_s18 = scalar_lea.vmem %s1890_s7, 2048  ;;  %p2658_p3 = scmp.lt.s32.totalorder %s1890_s7, %s1890_s7 }
 0x6ee   :  { %v1666_v23 = vmul.f32 0.01, %v1622_v18  ;;  %v1625_v24 = vadd.f32 %v2328_v21, %v3083_v51  ;;  %v1616_v25 = vpop.f32.mrb[55].mxu0  ;;  %p2654_p2 = scmp.ne.s32.totalorder %s1890_s7, %s2653_s18  ;;  %p2659_p4 = scmp.lt.s32.totalorder %s2653_s18, %s2653_s18 }
 0x6ef   :  { %v1664_v26 = vmul.f32 0.01, %v1614_v20  ;;  %v1617_v27 = vadd.f32 %v3083_v51, %v1616_v25  ;;  %2353 = vmatprep.mubr.bf16.mxu1 %v1692_v22 }
 0x6f0   :  { %v1667_v28 = vmul.f32 0.01, %v1625_v24  ;;  %2354 = vmatmul.mubr.bf16.vlgmr.msra.gmra.mrb[48].mxu1 %v1693_v17  ;;  %v1682_v30 = vmax.f32 %v1622_v18, %v1666_v23  ;;  %p2660_p5 = por %p2659_p4, %p2658_p3 }
 0x6f1   :  { %v1665_v16 = vmul.f32 0.01, %v1617_v27  ;;  %v1680_v32 = vmax.f32 %v1614_v20, %v1664_v26 }
 0x6f2   :  { %v1683_v31 = vmax.f32 %v1625_v24, %v1667_v28  ;;  %p2661_p6 = pnand %p2660_p5, %p2654_p2 }
 0x6f3   :  { %v1681_v33 = vmax.f32 %v1617_v27, %v1665_v16  ;;  %v2331_v35 = vpop.f32.mrb[56].mxu0 }
 0x6f4   :  { %v1638_v36 = vadd.f32 %v2331_v35, %v3083_v51  ;;  %v1629_v37 = vpop.f32.mrb[57].mxu0  ;;  %v1695_v38 = vpack.c.bf16 %v1683_v31, %v1682_v30 }
 0x6f5   :  { %v1630_v39 = vadd.f32 %v3083_v51, %v1629_v37  ;;  %v2332_v40 = vpop.f32.mrb[58].mxu0  ;;  %v1694_v41 = vpack.c.bf16 %v1681_v33, %v1680_v32 }
 0x6f6   :  { %v1670_v29 = vmul.f32 0.01, %v1638_v36  ;;  %v1641_v42 = vadd.f32 %v2332_v40, %v3083_v51  ;;  %v1632_v43 = vpop.f32.mrb[59].mxu0 }
 0x6f7   :  { %v1668_v44 = vmul.f32 0.01, %v1630_v39  ;;  %v1633_v45 = vadd.f32 %v3083_v51, %v1632_v43  ;;  %2357 = vmatprep.mubr.bf16.mxu1 %v1694_v41 }
 0x6f8   :  { %v1671_v34 = vmul.f32 0.01, %v1641_v42  ;;  %2358 = vmatmul.mubr.bf16.gmra.mrb[52].mxu1 %v1695_v38  ;;  %v1686_v48 = vmax.f32 %v1638_v36, %v1670_v29 }
 0x6f9   :  { %v1669_v47 = vmul.f32 0.01, %v1633_v45  ;;  %v1684_v50 = vmax.f32 %v1630_v39, %v1668_v44 }
 0x6fa   :  { %v1687_v49 = vmax.f32 %v1641_v42, %v1671_v34 }
 0x6fb   :  { %v1685_v52 = vmax.f32 %v1633_v45, %v1669_v47  ;;  %v2335_v53 = vpop.f32.mrb[60].mxu0 }
 0x6fc   :  { %v1654_v54 = vadd.f32 %v2335_v53, %v3083_v51  ;;  %v1645_v55 = vpop.f32.mrb[61].mxu0  ;;  %v1697_v56 = vpack.c.bf16 %v1687_v49, %v1686_v48 }
 0x6fd   :  { %v1646_v57 = vadd.f32 %v3083_v51, %v1645_v55  ;;  %v2336_v58 = vpop.f32.mrb[62].mxu0  ;;  %v1696_v46 = vpack.c.bf16 %v1685_v52, %v1684_v50 }
 0x6fe   :  { %v1674_v59 = vmul.f32 0.01, %v1654_v54  ;;  %v1657_v60 = vadd.f32 %v2336_v58, %v3083_v51  ;;  %v1648_v61 = vpop.f32.mrb[63].mxu0 }
 0x6ff   :  { %v1672_v62 = vmul.f32 0.01, %v1646_v57  ;;  %v1649_v0 = vadd.f32 %v3083_v51, %v1648_v61  ;;  %2361 = vmatprep.mubr.bf16.mxu1 %v1696_v46 }
 0x700   :  { %v1675_v1 = vmul.f32 0.01, %v1657_v60  ;;  %2362 = vmatmul.mubr.bf16.gmra.mrb[56].mxu1 %v1697_v56  ;;  %v1690_v3 = vmax.f32 %v1654_v54, %v1674_v59 }
 0x701   :  { %v1673_v2 = vmul.f32 0.01, %v1649_v0  ;;  %v1688_v5 = vmax.f32 %v1646_v57, %v1672_v62 }
 0x702   :  { %v1691_v4 = vmax.f32 %v1657_v60, %v1675_v1 }
 0x703   :  { %v1689_v6 = vmax.f32 %v1649_v0, %v1673_v2 }
 0x704   :  { %v1699_v7 = vpack.c.bf16 %v1691_v4, %v1690_v3 }
 0x705   :  { %v1698_v8 = vpack.c.bf16 %v1689_v6, %v1688_v5 }
 0x707   :  { %2365 = vmatprep.mubr.bf16.mxu1 %v1698_v8 }
 0x708   :  { %2366 = vmatmul.mubr.bf16.gmra.mrb[60].mxu1 %v1699_v7 }
 0x7c3   :  { %v2355_v10 = vpop.f32.mrb[48].mxu1 }
 0x7c4   :  { %v1814_v11 = vadd.f32 %v2355_v10, %v1976_v9  ;;  %v1805_v63 = vpop.f32.mrb[49].mxu1 }
 0x7c5   :  { %v1806_v51 = vadd.f32 %v1976_v9, %v1805_v63  ;;  %v2356_v12 = vpop.f32.mrb[50].mxu1 }
 0x7c6   :  { %1870 = vst [vmem:[#allocation17 + $0x10] sm:$0xff] %v1814_v11  ;;  %v1817_v13 = vadd.f32 %v2356_v12, %v1976_v9  ;;  %v1808_v14 = vpop.f32.mrb[51].mxu1 }
 0x7c7   :  { %1868 = vst [vmem:[#allocation17] sm:$0xff] %v1806_v51  ;;  %v1809_v15 = vadd.f32 %v1976_v9, %v1808_v14 }
 0x7c8   :  { %1871 = vst [vmem:[#allocation17 + $0x18] sm:$0xff] %v1817_v13 }
 0x7c9   :  { %1869 = vst [vmem:[#allocation17 + $0x8] sm:$0xff] %v1809_v15 }
 0x7cb   :  { %v2359_v17 = vpop.f32.mrb[52].mxu1 }
 0x7cc   :  { %v1830_v18 = vadd.f32 %v2359_v17, %v1976_v9  ;;  %v1821_v19 = vpop.f32.mrb[53].mxu1 }
 0x7cd   :  { %v1822_v20 = vadd.f32 %v1976_v9, %v1821_v19  ;;  %v2360_v21 = vpop.f32.mrb[54].mxu1 }
 0x7ce   :  { %1874 = vst [vmem:[#allocation17 + $0x30] sm:$0xff] %v1830_v18  ;;  %v1833_v22 = vadd.f32 %v2360_v21, %v1976_v9  ;;  %v1824_v23 = vpop.f32.mrb[55].mxu1 }
 0x7cf   :  { %1872 = vst [vmem:[#allocation17 + $0x20] sm:$0xff] %v1822_v20  ;;  %v1825_v24 = vadd.f32 %v1976_v9, %v1824_v23 }
 0x7d0   :  { %1875 = vst [vmem:[#allocation17 + $0x38] sm:$0xff] %v1833_v22 }
 0x7d1   :  { %1873 = vst [vmem:[#allocation17 + $0x28] sm:$0xff] %v1825_v24 }
 0x7d3   :  { %v2363_v25 = vpop.f32.mrb[56].mxu1 }
 0x7d4   :  { %v1846_v26 = vadd.f32 %v2363_v25, %v1976_v9  ;;  %v1837_v27 = vpop.f32.mrb[57].mxu1 }
 0x7d5   :  { %v1838_v28 = vadd.f32 %v1976_v9, %v1837_v27  ;;  %v2364_v16 = vpop.f32.mrb[58].mxu1 }
 0x7d6   :  { %1878 = vst [vmem:[#allocation17 + $0x50] sm:$0xff] %v1846_v26  ;;  %v1849_v30 = vadd.f32 %v2364_v16, %v1976_v9  ;;  %v1840_v31 = vpop.f32.mrb[59].mxu1 }
 0x7d7   :  { %1876 = vst [vmem:[#allocation17 + $0x40] sm:$0xff] %v1838_v28  ;;  %v1841_v32 = vadd.f32 %v1976_v9, %v1840_v31 }
 0x7d8   :  { %1879 = vst [vmem:[#allocation17 + $0x58] sm:$0xff] %v1849_v30 }
 0x7d9   :  { %1877 = vst [vmem:[#allocation17 + $0x48] sm:$0xff] %v1841_v32 }
 0x7db   :  { %v2367_v33 = vpop.f32.mrb[60].mxu1 }
 0x7dc   :  { %v1862_v35 = vadd.f32 %v2367_v33, %v1976_v9  ;;  %v1853_v36 = vpop.f32.mrb[61].mxu1 }
 0x7dd   :  { %v1854_v37 = vadd.f32 %v1976_v9, %v1853_v36  ;;  %v2368_v38 = vpop.f32.mrb[62].mxu1 }
 0x7de   :  { %1882 = vst [vmem:[#allocation17 + $0x70] sm:$0xff] %v1862_v35  ;;  %v1865_v39 = vadd.f32 %v2368_v38, %v1976_v9  ;;  %v1856_v40 = vpop.f32.mrb[63].mxu1 }
 0x7df   :  { %1880 = vst [vmem:[#allocation17 + $0x60] sm:$0xff] %v1854_v37  ;;  %v1857_v41 = vadd.f32 %v1976_v9, %v1856_v40 }
 0x7e0   :  { %1883 = vst [vmem:[#allocation17 + $0x78] sm:$0xff] %v1865_v39 }
 0x7e1   :  { %1881 = vst [vmem:[#allocation17 + $0x68] sm:$0xff] %v1857_v41 }
 0x7e2   :  { %2664 = shalt.err (!%p2661_p6)
}
 0x7e3   :  { %s3142_s20 = sld [smem:[#allocation26_spill]] }
 0x7e9   :  { %s2665_s5 = scalar_lea.hbm %s3142_s20, 2048 }
 0x7ea   :  { %p2666_p7 = scmp.ne.s32.totalorder %s3142_s20, %s2665_s5  ;;  %p2669_p8 = scmp.lt.u32.totalorder %s2665_s5, %s3142_s20 }
 0x7ec   :  { %p2671_p9 = pnand %p2669_p8, %p2666_p7 }
 0x7ee   :  { %2674 = shalt.err (!%p2671_p9)
}
 0x7ef   :  { %s2699_s17 = smov 128   ;;  %s2700_s28 = smov 8  }
 0x7f0   :  { %1895 = dma.vmem_to_hbm [thread:$0]  %s1890_s7, 2048, %s3142_s20, [#allocation4], %s2699_s17, %s2699_s17, %s2700_s28  }
 0x7f1   :  { %2685 = dma.done.wait [#allocation4], 2048  }
 0x7f2   :  { %2686 = vsyncadd [#allocation4], 4294965248 }
 0x7f3   :  { %1899 = vsyncpa [#allocation3], 1 }
 0x7f4   :  { %1900 = vsyncpa [#allocation6], 1 }
 0x7f5   :  { %1901 = vsyncpa [#allocation9], 1 }
 0x7f6   :  { %1902 = vsyncpa [#allocation12], 1 }
 0x7f7   :  { %1903 = vsyncpa [#allocation15], 1 }
 0x7f8   :  { %1904 = vsyncpa [#allocation4], 1 }

</bundles_post_ra>
